<compile_context>
chip_gen: v6e
topology: v6e:2x2x1
jax: 0.10.0
libtpu: 0.0.40
codegen_flags: <defaults>
</compile_context>

<pallas_src>
import jax
import jax.numpy as jnp
from jax import lax
from jax.experimental import pallas as pl
from jax.experimental.pallas import tpu as pltpu

EPS = 1e-5  # nn.BatchNorm2d default
CHANNELS = [(10, 128), (128, 64), (64, 32), (32, 1)]


# ----------------------------- BN helpers (in-kernel) ------------------------
def _bn_relu_dense(a, gamma, beta):
    """Training-mode BatchNorm2d + ReLU; lane == channel.

    a: (P, C) f32, gamma/beta: (1, C) f32.  One-pass stats, biased variance.
    """
    inv_n = 1.0 / a.shape[0]
    s1 = jnp.sum(a, axis=0, keepdims=True)                     # (1, C)
    s2 = jnp.sum(a * a, axis=0, keepdims=True)                 # (1, C)
    mean = s1 * inv_n
    var = jnp.maximum(s2 * inv_n - mean * mean, 0.0)
    scale = gamma * lax.rsqrt(var + EPS)
    shift = beta - mean * scale
    return jnp.maximum(a * scale + shift, 0.0)


def _bn_relu_tiled(a, gamma, beta, groups):
    """Training-mode BatchNorm2d + ReLU with tap-tiled lanes.

    a: (P, groups*C) f32 where lane = g*C + c (channel c replicated across
    `groups` lane groups).  Stats: column-sum, then fold the tiny (1,groups*C)
    row to (1,C); scale/shift are broadcast back tiled.  All math in f32.
    """
    c = a.shape[1] // groups
    s1 = jnp.sum(a, axis=0, keepdims=True)                     # (1, groups*C)
    s2 = jnp.sum(a * a, axis=0, keepdims=True)
    s1c = s1[:, :c]
    s2c = s2[:, :c]
    for g in range(1, groups):                                 # tiny row adds
        s1c = s1c + s1[:, g * c:(g + 1) * c]
        s2c = s2c + s2[:, g * c:(g + 1) * c]
    inv_n = 1.0 / (a.shape[0] * groups)
    mean = s1c * inv_n
    var = jnp.maximum(s2c * inv_n - mean * mean, 0.0)
    scale = gamma * lax.rsqrt(var + EPS)                       # (1, C)
    shift = beta - mean * scale
    scale_t = jnp.concatenate([scale] * groups, axis=1)        # (1, groups*C)
    shift_t = jnp.concatenate([shift] * groups, axis=1)
    return jnp.maximum(a * scale_t + shift_t, 0.0)


# ----------------------------- Pallas kernel --------------------------------
def _generator_kernel(x_ref, w1_ref, w2_ref, w3bd_ref, w4bdt_ref,
                      g1_ref, b1_ref, g2_ref, b2_ref, g3_ref, b3_ref,
                      g4_ref, b4_ref, o_ref):
    """All four ConvTranspose(k=2,s=2) + BN(train) + ReLU blocks, fully fused.

    x_ref     : (P0, 10)   bf16  pixel-major input, P0 = N*H*W
    w1_ref    : (10, 512)  bf16  fused weight, col = tap1*128 + c1
    w2_ref    : (128, 256) bf16  fused weight, col = tap2*64  + c2
    w3bd_ref  : (128, 256) bf16  block-diag(2 x W3f); row = dj2*64 + c2,
                                 col = dj2*128 + tap3*32 + c3
    w4bdt_ref : (32, 256)  bf16  transposed block-diag(8 x W4f);
                                 row = dj2*16 + tap3*4 + tap4,
                                 col = (dj2*4 + tap3)*32 + c3
    gL/bL     : (1, CoutL) f32   BN gamma / beta
    o_ref     : (32, 8*P0) f32   row = (dj2,di3,dj3,di4,dj4),
                                 col = di2*4P0 + tap1*P0 + p0
    """
    f32 = jnp.float32
    bf16 = jnp.bfloat16

    # ---- layer 1: (P0,10) @ (10,4*128) ----
    y1 = jnp.dot(x_ref[...], w1_ref[...], preferred_element_type=f32)   # (P0,512)
    # Full tap fold -> rows: 128-aligned column slices (pure vreg selection).
    a1 = jnp.concatenate([y1[:, k * 128:(k + 1) * 128] for k in range(4)],
                         axis=0)                                         # (4P0,128)
    a1 = _bn_relu_dense(a1, g1_ref[...], b1_ref[...])

    # ---- layer 2: (4P0,128) @ (128,4*64) ----
    y2 = jnp.dot(a1.astype(bf16), w2_ref[...], preferred_element_type=f32)  # (4P0,256)
    # Half fold: only the 128-aligned tap pair (di2) moves to rows; the tap
    # LSB (dj2) stays on lanes so the activation remains 128-lane dense.
    a2 = jnp.concatenate([y2[:, :128], y2[:, 128:]], axis=0)             # (8P0,128)
    a2 = _bn_relu_tiled(a2, g2_ref[...], b2_ref[...], groups=2)

    # ---- layer 3: block-diagonal weight absorbs the lane-resident dj2 tap;
    #      no fold at all.  Output lane = dj2*128 + tap3*32 + c3.
    y3 = jnp.dot(a2.astype(bf16), w3bd_ref[...], preferred_element_type=f32)  # (8P0,256)
    a3 = _bn_relu_tiled(y3, g3_ref[...], b3_ref[...], groups=8)

    # ---- layer 4 (Cout = 1): transposed block-diagonal matmul, K = 256.
    #      Output (32, 8P0) is sublane- and lane-dense for the HBM store.
    o = lax.dot_general(w4bdt_ref[...], a3.astype(bf16),
                        (((1,), (1,)), ((), ())),
                        preferred_element_type=f32)                      # (32,8P0)
    inv_n = 1.0 / o.size                                                 # C=1
    mean = jnp.sum(o) * inv_n
    var = jnp.maximum(jnp.sum(o * o) * inv_n - mean * mean, 0.0)
    scale = g4_ref[...] * lax.rsqrt(var + EPS)                           # (1,1)
    shift = b4_ref[...] - mean * scale
    o_ref[...] = jnp.maximum(o * scale + shift, 0.0)


# ------------------------------ wrapper --------------------------------------
def _fuse_weight(w):
    """(Cin, Cout, 2, 2) -> (Cin, 4*Cout); columns ordered (tap, channel)."""
    cin, cout = w.shape[0], w.shape[1]
    return jnp.transpose(w, (0, 2, 3, 1)).reshape(cin, 4 * cout)


def _block_diag(m, k):
    """k copies of `m` on the diagonal: (k*rows, k*cols)."""
    return jnp.kron(jnp.eye(k, dtype=m.dtype), m)


@jax.jit
def generator_forward(x, params):
    N, C0, H, W = x.shape
    assert C0 == CHANNELS[0][0]
    P0 = N * H * W

    (w1, _, g1, be1), (w2, _, g2, be2), (w3, _, g3, be3), (w4, _, g4, be4) = params
    # Conv biases intentionally dropped: training-mode BN cancels them exactly.
    bf16 = jnp.bfloat16
    w1f = _fuse_weight(w1).astype(bf16)                        # (10, 512)
    w2f = _fuse_weight(w2).astype(bf16)                        # (128, 256)
    w3bd = _block_diag(_fuse_weight(w3), 2).astype(bf16)       # (128, 256)
    assert w4.shape[1] == 1
    w4f = w4.reshape(w4.shape[0], 4)                           # (32, 4), col = tap4
    w4bdt = _block_diag(w4f.T, 8).astype(bf16)                 # (32, 256)

    x2 = jnp.transpose(x, (0, 2, 3, 1)).reshape(P0, C0).astype(bf16)
    row = lambda v: v.reshape(1, -1).astype(jnp.float32)

    # Explicit VMEM budget.  Worst case (no buffer reuse) ~40 KiB / input
    # pixel of live activations plus ~0.2 MiB of weights; steady-state peak is
    # ~15 KiB/px (layer-3 matmul: a2 f32 + a2 bf16 + y3 f32).  Capped at
    # 64 MiB so the same limit is valid on v5e/v6e/v7x; that caps P0 at
    # roughly 1.5K px (conservative) to ~3.5K px (steady-state) — beyond that,
    # move to a pixel-tiled grid with a two-phase BN (also unlocks v7x's 2 TCs).
    vmem_limit = min(64 * 1024 * 1024, 4 * 1024 * 1024 + 40 * 1024 * P0)

    out = pl.pallas_call(
        _generator_kernel,
        out_shape=jax.ShapeDtypeStruct((32, 8 * P0), jnp.float32),
        in_specs=[pl.BlockSpec(memory_space=pltpu.MemorySpace.VMEM)] * 13,
        out_specs=pl.BlockSpec(memory_space=pltpu.MemorySpace.VMEM),
        compiler_params=pltpu.CompilerParams(vmem_limit_bytes=vmem_limit),
    )(x2, w1f, w2f, w3bd, w4bdt,
      row(g1), row(be1), row(g2), row(be2), row(g3), row(be3), row(g4), row(be4))

    # Morton-style unscramble as a pure reshape + transpose (no gather):
    #   out[r, q]: r = (dj2, di3, dj3, di4, dj4),
    #              q = (di2, di1, dj1, n, i0, j0)
    #   I = 16*i0 + 8*di1 + 4*di2 + 2*di3 + di4
    #   J = 16*j0 + 8*dj1 + 4*dj2 + 2*dj3 + dj4
    o = out.reshape(2, 2, 2, 2, 2, 2, 2, 2, N, H, W)
    o = jnp.transpose(o, (8, 9, 6, 5, 1, 3, 10, 7, 0, 2, 4))
    return o.reshape(N, 1, 16 * H, 16 * W)


# ------------------------------ params ---------------------------------------
def init_generator_params(key):
    """Deterministic synthetic parameters (shapes from Generator.__init__)."""
    params = []
    for (cin, cout) in CHANNELS:
        key, kw, kb, kg, kbe = jax.random.split(key, 5)
        w = jax.random.normal(kw, (cin, cout, 2, 2), jnp.float32) * 0.1
        b = jax.random.normal(kb, (cout,), jnp.float32) * 0.05
        # Randomize BN affine (instead of 1/0 defaults) to exercise that path.
        gamma = 1.0 + 0.1 * jax.random.normal(kg, (cout,), jnp.float32)
        beta = 0.05 * jax.random.normal(kbe, (cout,), jnp.float32)
        params.append((w, b, gamma, beta))
    return params


# ---------------- pure-JAX reference (independent code path) -----------------
def _ref_layer(x, w, b, gamma, beta):
    N, Cin, H, W = x.shape
    Cout = w.shape[1]
    y = jnp.einsum('ncij,codk->noidjk', x, w) + b[None, :, None, None, None, None]
    y = y.reshape(N, Cout, 2 * H, 2 * W)
    mean = y.mean(axis=(0, 2, 3), keepdims=True)
    var = ((y - mean) ** 2).mean(axis=(0, 2, 3), keepdims=True)
    y_hat = (y - mean) / jnp.sqrt(var + EPS)
    z = y_hat * gamma[None, :, None, None] + beta[None, :, None, None]
    return jnp.maximum(z, 0.0)


def _ref_forward(x, params):
    for (w, b, gamma, beta) in params:
        x = _ref_layer(x, w, b, gamma, beta)
    return x


if __name__ == "__main__":
    key = jax.random.PRNGKey(0)
    key, kx = jax.random.split(key)

    # Small input consistent with the module: NCHW, 10 input channels.
    x = jax.random.normal(kx, (2, 10, 4, 4), jnp.float32)
    params = init_generator_params(key)

    out = jax.block_until_ready(generator_forward(x, params))
    assert out.shape == (2, 1, 64, 64), out.shape

    ref = jax.block_until_ready(_ref_forward(x, params))
    # Tolerance loosened vs. the f32 reference because the MXU matmuls now use
    # bf16 inputs (f32 accumulation); BN statistics / affine stay in f32.
    if not jnp.allclose(out, ref, rtol=3e-2, atol=3e-2):
        err = float(jnp.max(jnp.abs(out - ref)))
        raise AssertionError(
            f"Pallas kernel output mismatch vs JAX reference (max abs err {err})")

    print("KERNEL_OK")
</pallas_src>

<mosaic_0001>
module attributes {stable_mosaic.version = 11 : i64} {
  func.func @_generator_kernel(%arg0: memref<32x10xbf16, #tpu.memory_space<vmem>>, %arg1: memref<10x512xbf16, #tpu.memory_space<vmem>>, %arg2: memref<128x256xbf16, #tpu.memory_space<vmem>>, %arg3: memref<128x256xbf16, #tpu.memory_space<vmem>>, %arg4: memref<32x256xbf16, #tpu.memory_space<vmem>>, %arg5: memref<1x128xf32, #tpu.memory_space<vmem>>, %arg6: memref<1x128xf32, #tpu.memory_space<vmem>>, %arg7: memref<1x64xf32, #tpu.memory_space<vmem>>, %arg8: memref<1x64xf32, #tpu.memory_space<vmem>>, %arg9: memref<1x32xf32, #tpu.memory_space<vmem>>, %arg10: memref<1x32xf32, #tpu.memory_space<vmem>>, %arg11: memref<1x1xf32, #tpu.memory_space<vmem>>, %arg12: memref<1x1xf32, #tpu.memory_space<vmem>>, %arg13: memref<32x256xf32, #tpu.memory_space<vmem>>) attributes {dimension_semantics = [], scalar_prefetch = 0 : i64, scratch_operands = 0 : i64, tpu.core_type = #tpu.core_type<tc>} {
    %c0 = arith.constant 0 : index
    %c0_0 = arith.constant 0 : index
    %0 = vector.load %arg0[%c0, %c0_0] : memref<32x10xbf16, #tpu.memory_space<vmem>>, vector<32x10xbf16>
    %c0_1 = arith.constant 0 : index
    %c0_2 = arith.constant 0 : index
    %1 = vector.load %arg1[%c0_1, %c0_2] : memref<10x512xbf16, #tpu.memory_space<vmem>>, vector<10x512xbf16>
    %cst = arith.constant dense<0.000000e+00> : vector<32x512xf32>
    %2 = tpu.matmul %0, %1, %cst {dimension_numbers = #tpu.dot_dimension_numbers<[1], [0], [0], [1], [0, 0, 1, 1], [], []>} : vector<32x10xbf16>, vector<10x512xbf16>, vector<32x512xf32> -> vector<32x512xf32>
    %3 = vector.extract_strided_slice %2 {offsets = [0, 0], sizes = [32, 128], strides = [1, 1]} : vector<32x512xf32> to vector<32x128xf32>
    %4 = vector.extract_strided_slice %2 {offsets = [0, 128], sizes = [32, 128], strides = [1, 1]} : vector<32x512xf32> to vector<32x128xf32>
    %5 = vector.extract_strided_slice %2 {offsets = [0, 256], sizes = [32, 128], strides = [1, 1]} : vector<32x512xf32> to vector<32x128xf32>
    %6 = vector.extract_strided_slice %2 {offsets = [0, 384], sizes = [32, 128], strides = [1, 1]} : vector<32x512xf32> to vector<32x128xf32>
    %7 = tpu.concatenate %3, %4, %5, %6 in 0 : vector<32x128xf32>, vector<32x128xf32>, vector<32x128xf32>, vector<32x128xf32> -> vector<128x128xf32>
    %c0_3 = arith.constant 0 : index
    %c0_4 = arith.constant 0 : index
    %8 = vector.load %arg5[%c0_3, %c0_4] : memref<1x128xf32, #tpu.memory_space<vmem>>, vector<1x128xf32>
    %c0_5 = arith.constant 0 : index
    %c0_6 = arith.constant 0 : index
    %9 = vector.load %arg6[%c0_5, %c0_6] : memref<1x128xf32, #tpu.memory_space<vmem>>, vector<1x128xf32>
    %cst_7 = arith.constant dense<0.000000e+00> : vector<128xf32>
    %10 = vector.multi_reduction <add>, %7, %cst_7 [0] : vector<128x128xf32> to vector<128xf32>
    %11 = vector.shape_cast %10 : vector<128xf32> to vector<1x128xf32>
    %12 = arith.mulf %7, %7 : vector<128x128xf32>
    %cst_8 = arith.constant dense<0.000000e+00> : vector<128xf32>
    %13 = vector.multi_reduction <add>, %12, %cst_8 [0] : vector<128x128xf32> to vector<128xf32>
    %14 = vector.shape_cast %13 : vector<128xf32> to vector<1x128xf32>
    %cst_9 = arith.constant 7.812500e-03 : f32
    %15 = vector.broadcast %cst_9 : f32 to vector<1x128xf32>
    %16 = arith.mulf %11, %15 : vector<1x128xf32>
    %cst_10 = arith.constant 7.812500e-03 : f32
    %17 = vector.broadcast %cst_10 : f32 to vector<1x128xf32>
    %18 = arith.mulf %14, %17 : vector<1x128xf32>
    %19 = arith.mulf %16, %16 : vector<1x128xf32>
    %20 = arith.subf %18, %19 : vector<1x128xf32>
    %cst_11 = arith.constant 0.000000e+00 : f32
    %21 = vector.broadcast %cst_11 : f32 to vector<1x128xf32>
    %22 = arith.maximumf %20, %21 : vector<1x128xf32>
    %cst_12 = arith.constant 9.99999974E-6 : f32
    %23 = vector.broadcast %cst_12 : f32 to vector<1x128xf32>
    %24 = arith.addf %22, %23 : vector<1x128xf32>
    %25 = math.rsqrt %24 : vector<1x128xf32>
    %26 = arith.mulf %8, %25 : vector<1x128xf32>
    %27 = arith.mulf %16, %26 : vector<1x128xf32>
    %28 = arith.subf %9, %27 : vector<1x128xf32>
    %29 = vector.broadcast %26 : vector<1x128xf32> to vector<128x128xf32>
    %30 = arith.mulf %7, %29 : vector<128x128xf32>
    %31 = vector.broadcast %28 : vector<1x128xf32> to vector<128x128xf32>
    %32 = arith.addf %30, %31 : vector<128x128xf32>
    %cst_13 = arith.constant 0.000000e+00 : f32
    %33 = vector.broadcast %cst_13 : f32 to vector<128x128xf32>
    %34 = arith.maximumf %32, %33 : vector<128x128xf32>
    %35 = arith.truncf %34 : vector<128x128xf32> to vector<128x128xbf16>
    %c0_14 = arith.constant 0 : index
    %c0_15 = arith.constant 0 : index
    %36 = vector.load %arg2[%c0_14, %c0_15] : memref<128x256xbf16, #tpu.memory_space<vmem>>, vector<128x256xbf16>
    %cst_16 = arith.constant dense<0.000000e+00> : vector<128x256xf32>
    %37 = tpu.matmul %35, %36, %cst_16 {dimension_numbers = #tpu.dot_dimension_numbers<[1], [0], [0], [1], [0, 0, 1, 1], [], []>} : vector<128x128xbf16>, vector<128x256xbf16>, vector<128x256xf32> -> vector<128x256xf32>
    %38 = vector.extract_strided_slice %37 {offsets = [0, 0], sizes = [128, 128], strides = [1, 1]} : vector<128x256xf32> to vector<128x128xf32>
    %39 = vector.extract_strided_slice %37 {offsets = [0, 128], sizes = [128, 128], strides = [1, 1]} : vector<128x256xf32> to vector<128x128xf32>
    %40 = tpu.concatenate %38, %39 in 0 : vector<128x128xf32>, vector<128x128xf32> -> vector<256x128xf32>
    %c0_17 = arith.constant 0 : index
    %c0_18 = arith.constant 0 : index
    %41 = vector.load %arg7[%c0_17, %c0_18] : memref<1x64xf32, #tpu.memory_space<vmem>>, vector<1x64xf32>
    %c0_19 = arith.constant 0 : index
    %c0_20 = arith.constant 0 : index
    %42 = vector.load %arg8[%c0_19, %c0_20] : memref<1x64xf32, #tpu.memory_space<vmem>>, vector<1x64xf32>
    %cst_21 = arith.constant dense<0.000000e+00> : vector<128xf32>
    %43 = vector.multi_reduction <add>, %40, %cst_21 [0] : vector<256x128xf32> to vector<128xf32>
    %44 = vector.shape_cast %43 : vector<128xf32> to vector<1x128xf32>
    %45 = arith.mulf %40, %40 : vector<256x128xf32>
    %cst_22 = arith.constant dense<0.000000e+00> : vector<128xf32>
    %46 = vector.multi_reduction <add>, %45, %cst_22 [0] : vector<256x128xf32> to vector<128xf32>
    %47 = vector.shape_cast %46 : vector<128xf32> to vector<1x128xf32>
    %48 = vector.extract_strided_slice %44 {offsets = [0, 0], sizes = [1, 64], strides = [1, 1]} : vector<1x128xf32> to vector<1x64xf32>
    %49 = vector.extract_strided_slice %47 {offsets = [0, 0], sizes = [1, 64], strides = [1, 1]} : vector<1x128xf32> to vector<1x64xf32>
    %50 = vector.extract_strided_slice %44 {offsets = [0, 64], sizes = [1, 64], strides = [1, 1]} : vector<1x128xf32> to vector<1x64xf32>
    %51 = arith.addf %48, %50 : vector<1x64xf32>
    %52 = vector.extract_strided_slice %47 {offsets = [0, 64], sizes = [1, 64], strides = [1, 1]} : vector<1x128xf32> to vector<1x64xf32>
    %53 = arith.addf %49, %52 : vector<1x64xf32>
    %cst_23 = arith.constant 0.001953125 : f32
    %54 = vector.broadcast %cst_23 : f32 to vector<1x64xf32>
    %55 = arith.mulf %51, %54 : vector<1x64xf32>
    %cst_24 = arith.constant 0.001953125 : f32
    %56 = vector.broadcast %cst_24 : f32 to vector<1x64xf32>
    %57 = arith.mulf %53, %56 : vector<1x64xf32>
    %58 = arith.mulf %55, %55 : vector<1x64xf32>
    %59 = arith.subf %57, %58 : vector<1x64xf32>
    %cst_25 = arith.constant 0.000000e+00 : f32
    %60 = vector.broadcast %cst_25 : f32 to vector<1x64xf32>
    %61 = arith.maximumf %59, %60 : vector<1x64xf32>
    %cst_26 = arith.constant 9.99999974E-6 : f32
    %62 = vector.broadcast %cst_26 : f32 to vector<1x64xf32>
    %63 = arith.addf %61, %62 : vector<1x64xf32>
    %64 = math.rsqrt %63 : vector<1x64xf32>
    %65 = arith.mulf %41, %64 : vector<1x64xf32>
    %66 = arith.mulf %55, %65 : vector<1x64xf32>
    %67 = arith.subf %42, %66 : vector<1x64xf32>
    %68 = tpu.concatenate %65, %65 in 1 : vector<1x64xf32>, vector<1x64xf32> -> vector<1x128xf32>
    %69 = tpu.concatenate %67, %67 in 1 : vector<1x64xf32>, vector<1x64xf32> -> vector<1x128xf32>
    %70 = vector.broadcast %68 : vector<1x128xf32> to vector<256x128xf32>
    %71 = arith.mulf %40, %70 : vector<256x128xf32>
    %72 = vector.broadcast %69 : vector<1x128xf32> to vector<256x128xf32>
    %73 = arith.addf %71, %72 : vector<256x128xf32>
    %cst_27 = arith.constant 0.000000e+00 : f32
    %74 = vector.broadcast %cst_27 : f32 to vector<256x128xf32>
    %75 = arith.maximumf %73, %74 : vector<256x128xf32>
    %76 = arith.truncf %75 : vector<256x128xf32> to vector<256x128xbf16>
    %c0_28 = arith.constant 0 : index
    %c0_29 = arith.constant 0 : index
    %77 = vector.load %arg3[%c0_28, %c0_29] : memref<128x256xbf16, #tpu.memory_space<vmem>>, vector<128x256xbf16>
    %cst_30 = arith.constant dense<0.000000e+00> : vector<256x256xf32>
    %78 = tpu.matmul %76, %77, %cst_30 {dimension_numbers = #tpu.dot_dimension_numbers<[1], [0], [0], [1], [0, 0, 1, 1], [], []>} : vector<256x128xbf16>, vector<128x256xbf16>, vector<256x256xf32> -> vector<256x256xf32>
    %c0_31 = arith.constant 0 : index
    %c0_32 = arith.constant 0 : index
    %79 = vector.load %arg9[%c0_31, %c0_32] : memref<1x32xf32, #tpu.memory_space<vmem>>, vector<1x32xf32>
    %c0_33 = arith.constant 0 : index
    %c0_34 = arith.constant 0 : index
    %80 = vector.load %arg10[%c0_33, %c0_34] : memref<1x32xf32, #tpu.memory_space<vmem>>, vector<1x32xf32>
    %cst_35 = arith.constant dense<0.000000e+00> : vector<256xf32>
    %81 = vector.multi_reduction <add>, %78, %cst_35 [0] : vector<256x256xf32> to vector<256xf32>
    %82 = vector.shape_cast %81 : vector<256xf32> to vector<1x256xf32>
    %83 = arith.mulf %78, %78 : vector<256x256xf32>
    %cst_36 = arith.constant dense<0.000000e+00> : vector<256xf32>
    %84 = vector.multi_reduction <add>, %83, %cst_36 [0] : vector<256x256xf32> to vector<256xf32>
    %85 = vector.shape_cast %84 : vector<256xf32> to vector<1x256xf32>
    %86 = vector.extract_strided_slice %82 {offsets = [0, 0], sizes = [1, 32], strides = [1, 1]} : vector<1x256xf32> to vector<1x32xf32>
    %87 = vector.extract_strided_slice %85 {offsets = [0, 0], sizes = [1, 32], strides = [1, 1]} : vector<1x256xf32> to vector<1x32xf32>
    %88 = vector.extract_strided_slice %82 {offsets = [0, 32], sizes = [1, 32], strides = [1, 1]} : vector<1x256xf32> to vector<1x32xf32>
    %89 = arith.addf %86, %88 : vector<1x32xf32>
    %90 = vector.extract_strided_slice %85 {offsets = [0, 32], sizes = [1, 32], strides = [1, 1]} : vector<1x256xf32> to vector<1x32xf32>
    %91 = arith.addf %87, %90 : vector<1x32xf32>
    %92 = vector.extract_strided_slice %82 {offsets = [0, 64], sizes = [1, 32], strides = [1, 1]} : vector<1x256xf32> to vector<1x32xf32>
    %93 = arith.addf %89, %92 : vector<1x32xf32>
    %94 = vector.extract_strided_slice %85 {offsets = [0, 64], sizes = [1, 32], strides = [1, 1]} : vector<1x256xf32> to vector<1x32xf32>
    %95 = arith.addf %91, %94 : vector<1x32xf32>
    %96 = vector.extract_strided_slice %82 {offsets = [0, 96], sizes = [1, 32], strides = [1, 1]} : vector<1x256xf32> to vector<1x32xf32>
    %97 = arith.addf %93, %96 : vector<1x32xf32>
    %98 = vector.extract_strided_slice %85 {offsets = [0, 96], sizes = [1, 32], strides = [1, 1]} : vector<1x256xf32> to vector<1x32xf32>
    %99 = arith.addf %95, %98 : vector<1x32xf32>
    %100 = vector.extract_strided_slice %82 {offsets = [0, 128], sizes = [1, 32], strides = [1, 1]} : vector<1x256xf32> to vector<1x32xf32>
    %101 = arith.addf %97, %100 : vector<1x32xf32>
    %102 = vector.extract_strided_slice %85 {offsets = [0, 128], sizes = [1, 32], strides = [1, 1]} : vector<1x256xf32> to vector<1x32xf32>
    %103 = arith.addf %99, %102 : vector<1x32xf32>
    %104 = vector.extract_strided_slice %82 {offsets = [0, 160], sizes = [1, 32], strides = [1, 1]} : vector<1x256xf32> to vector<1x32xf32>
    %105 = arith.addf %101, %104 : vector<1x32xf32>
    %106 = vector.extract_strided_slice %85 {offsets = [0, 160], sizes = [1, 32], strides = [1, 1]} : vector<1x256xf32> to vector<1x32xf32>
    %107 = arith.addf %103, %106 : vector<1x32xf32>
    %108 = vector.extract_strided_slice %82 {offsets = [0, 192], sizes = [1, 32], strides = [1, 1]} : vector<1x256xf32> to vector<1x32xf32>
    %109 = arith.addf %105, %108 : vector<1x32xf32>
    %110 = vector.extract_strided_slice %85 {offsets = [0, 192], sizes = [1, 32], strides = [1, 1]} : vector<1x256xf32> to vector<1x32xf32>
    %111 = arith.addf %107, %110 : vector<1x32xf32>
    %112 = vector.extract_strided_slice %82 {offsets = [0, 224], sizes = [1, 32], strides = [1, 1]} : vector<1x256xf32> to vector<1x32xf32>
    %113 = arith.addf %109, %112 : vector<1x32xf32>
    %114 = vector.extract_strided_slice %85 {offsets = [0, 224], sizes = [1, 32], strides = [1, 1]} : vector<1x256xf32> to vector<1x32xf32>
    %115 = arith.addf %111, %114 : vector<1x32xf32>
    %cst_37 = arith.constant 4.8828125E-4 : f32
    %116 = vector.broadcast %cst_37 : f32 to vector<1x32xf32>
    %117 = arith.mulf %113, %116 : vector<1x32xf32>
    %cst_38 = arith.constant 4.8828125E-4 : f32
    %118 = vector.broadcast %cst_38 : f32 to vector<1x32xf32>
    %119 = arith.mulf %115, %118 : vector<1x32xf32>
    %120 = arith.mulf %117, %117 : vector<1x32xf32>
    %121 = arith.subf %119, %120 : vector<1x32xf32>
    %cst_39 = arith.constant 0.000000e+00 : f32
    %122 = vector.broadcast %cst_39 : f32 to vector<1x32xf32>
    %123 = arith.maximumf %121, %122 : vector<1x32xf32>
    %cst_40 = arith.constant 9.99999974E-6 : f32
    %124 = vector.broadcast %cst_40 : f32 to vector<1x32xf32>
    %125 = arith.addf %123, %124 : vector<1x32xf32>
    %126 = math.rsqrt %125 : vector<1x32xf32>
    %127 = arith.mulf %79, %126 : vector<1x32xf32>
    %128 = arith.mulf %117, %127 : vector<1x32xf32>
    %129 = arith.subf %80, %128 : vector<1x32xf32>
    %130 = tpu.concatenate %127, %127, %127, %127, %127, %127, %127, %127 in 1 : vector<1x32xf32>, vector<1x32xf32>, vector<1x32xf32>, vector<1x32xf32>, vector<1x32xf32>, vector<1x32xf32>, vector<1x32xf32>, vector<1x32xf32> -> vector<1x256xf32>
    %131 = tpu.concatenate %129, %129, %129, %129, %129, %129, %129, %129 in 1 : vector<1x32xf32>, vector<1x32xf32>, vector<1x32xf32>, vector<1x32xf32>, vector<1x32xf32>, vector<1x32xf32>, vector<1x32xf32>, vector<1x32xf32> -> vector<1x256xf32>
    %132 = vector.broadcast %130 : vector<1x256xf32> to vector<256x256xf32>
    %133 = arith.mulf %78, %132 : vector<256x256xf32>
    %134 = vector.broadcast %131 : vector<1x256xf32> to vector<256x256xf32>
    %135 = arith.addf %133, %134 : vector<256x256xf32>
    %cst_41 = arith.constant 0.000000e+00 : f32
    %136 = vector.broadcast %cst_41 : f32 to vector<256x256xf32>
    %137 = arith.maximumf %135, %136 : vector<256x256xf32>
    %c0_42 = arith.constant 0 : index
    %c0_43 = arith.constant 0 : index
    %138 = vector.load %arg4[%c0_42, %c0_43] : memref<32x256xbf16, #tpu.memory_space<vmem>>, vector<32x256xbf16>
    %139 = arith.truncf %137 : vector<256x256xf32> to vector<256x256xbf16>
    %cst_44 = arith.constant dense<0.000000e+00> : vector<32x256xf32>
    %140 = tpu.matmul %138, %139, %cst_44 {dimension_numbers = #tpu.dot_dimension_numbers<[1], [1], [0], [0], [0, 0, 1, 0], [], []>} : vector<32x256xbf16>, vector<256x256xbf16>, vector<32x256xf32> -> vector<32x256xf32>
    %141 = vector.shape_cast %140 : vector<32x256xf32> to vector<1x32x256xf32>
    %cst_45 = arith.constant dense<0.000000e+00> : vector<1xf32>
    %142 = vector.multi_reduction <add>, %141, %cst_45 [1, 2] : vector<1x32x256xf32> to vector<1xf32>
    %143 = vector.shape_cast %142 : vector<1xf32> to vector<1x1x1xf32>
    %144 = vector.extract %143[0, 0, 0] : f32 from vector<1x1x1xf32>
    %cst_46 = arith.constant 1.22070313E-4 : f32
    %145 = arith.mulf %144, %cst_46 : f32
    %146 = arith.mulf %140, %140 : vector<32x256xf32>
    %147 = vector.shape_cast %146 : vector<32x256xf32> to vector<1x32x256xf32>
    %cst_47 = arith.constant dense<0.000000e+00> : vector<1xf32>
    %148 = vector.multi_reduction <add>, %147, %cst_47 [1, 2] : vector<1x32x256xf32> to vector<1xf32>
    %149 = vector.shape_cast %148 : vector<1xf32> to vector<1x1x1xf32>
    %150 = vector.extract %149[0, 0, 0] : f32 from vector<1x1x1xf32>
    %cst_48 = arith.constant 1.22070313E-4 : f32
    %151 = arith.mulf %150, %cst_48 : f32
    %152 = arith.mulf %145, %145 : f32
    %153 = arith.subf %151, %152 : f32
    %cst_49 = arith.constant 0.000000e+00 : f32
    %154 = arith.maximumf %153, %cst_49 : f32
    %c0_50 = arith.constant 0 : index
    %c0_51 = arith.constant 0 : index
    %155 = vector.load %arg11[%c0_50, %c0_51] : memref<1x1xf32, #tpu.memory_space<vmem>>, vector<1x1xf32>
    %cst_52 = arith.constant 9.99999974E-6 : f32
    %156 = arith.addf %154, %cst_52 : f32
    %157 = math.rsqrt %156 : f32
    %158 = vector.broadcast %157 : f32 to vector<1x1xf32>
    %159 = arith.mulf %155, %158 : vector<1x1xf32>
    %c0_53 = arith.constant 0 : index
    %c0_54 = arith.constant 0 : index
    %160 = vector.load %arg12[%c0_53, %c0_54] : memref<1x1xf32, #tpu.memory_space<vmem>>, vector<1x1xf32>
    %161 = vector.broadcast %145 : f32 to vector<1x1xf32>
    %162 = arith.mulf %161, %159 : vector<1x1xf32>
    %163 = arith.subf %160, %162 : vector<1x1xf32>
    %164 = vector.broadcast %159 : vector<1x1xf32> to vector<32x256xf32>
    %165 = arith.mulf %140, %164 : vector<32x256xf32>
    %166 = vector.broadcast %163 : vector<1x1xf32> to vector<32x256xf32>
    %167 = arith.addf %165, %166 : vector<32x256xf32>
    %cst_55 = arith.constant 0.000000e+00 : f32
    %168 = vector.broadcast %cst_55 : f32 to vector<32x256xf32>
    %169 = arith.maximumf %167, %168 : vector<32x256xf32>
    %c0_56 = arith.constant 0 : index
    %c0_57 = arith.constant 0 : index
    %170 = vector.load %arg13[%c0_56, %c0_57] : memref<32x256xf32, #tpu.memory_space<vmem>>, vector<32x256xf32>
    tpu.vector_store %arg13[%c0_56, %c0_57], %169 {strides = array<i32>} : memref<32x256xf32, #tpu.memory_space<vmem>>, vector<32x256xf32>,
    return
  }
}

</mosaic_0001>

<bundles_post_ra>
// kernel: generator_forward.1
= control target key start
LH: loop header
LB: loop body
LE: loop exit
PB: predicated region body
PF: predicated region fallthrough
CT: control target
= control target key end

     0   :  { %s3695_s0 = inlined_call_operand.vmem [shape: bf16[32,10], index: 0, kind: input, shape index: {}]   ;;  %s3696_s1 = inlined_call_operand.vmem [shape: bf16[10,512], index: 1, kind: input, shape index: {}]   ;;  %s3697_s2 = inlined_call_operand.vmem [shape: bf16[128,256], index: 2, kind: input, shape index: {}]   ;;  %s3698_s3 = inlined_call_operand.vmem [shape: bf16[128,256], index: 3, kind: input, shape index: {}]   ;;  %s3699_s4 = inlined_call_operand.vmem [shape: bf16[32,256], index: 4, kind: input, shape index: {}]   ;;  %s3700_s5 = inlined_call_operand.hbm [shape: f32[1,128], index: 5, kind: input, shape index: {}]   ;;  %s3701_s6 = inlined_call_operand.hbm [shape: f32[1,128], index: 6, kind: input, shape index: {}]   ;;  %s3702_s7 = inlined_call_operand.hbm [shape: f32[1,64], index: 7, kind: input, shape index: {}]   ;;  %s3703_s8 = inlined_call_operand.hbm [shape: f32[1,64], index: 8, kind: input, shape index: {}]   ;;  %s3704_s9 = inlined_call_operand.hbm [shape: f32[1,32], index: 9, kind: input, shape index: {}]   ;;  %s3705_s10 = inlined_call_operand.hbm [shape: f32[1,32], index: 10, kind: input, shape index: {}]   ;;  %s3706_s11 = inlined_call_operand.<no memory space> [shape: f32[1,1], index: 11, kind: input, shape index: {}]   ;;  %s3707_s13 = inlined_call_operand.vmem [shape: f32[32,256], index: 13, kind: output, shape index: {}]   ;;  %s3708_s12 = inlined_call_operand.<no memory space> [shape: f32[1,1], index: 12, kind: input, shape index: {}]  }
   0x1   :  { %v18_v0 = vstv %s3706_s11  ;;  %v20_v1 = vstv %s3708_s12 }
   0x2   :  { %19 = vst [vmem:[#allocation2] sm:$0x1] %v18_v0  ;;  %21 = vst [vmem:[#allocation3] sm:$0x1] %v20_v1 }
   0x3   :  { %22 = vsyncpa [#allocation5], 0 }
   0x4   :  { %23 = vsyncpa [#allocation7], 0 }
   0x5   :  { %24 = vsyncpa [#allocation10], 0 }
   0x6   :  { %25 = vsyncpa [#allocation13], 0  ;;  %s2216_s29 = smov [#allocation6]   ;;  %s2217_s14 = smov [#allocation9]  }
   0x7   :  { %s52_s30 = sshll.u32 %s2216_s29, 4  ;;  %s72_s15 = sshll.u32 %s2217_s14, 4  ;;  %s53_s30 = int_to_ptr.vmem [resolvable:$true] %s52_s30  ;;  %s73_s15 = int_to_ptr.vmem [resolvable:$true] %s72_s15 }
   0x8   :  { %s2096_s16 = scalar_lea.vmem %s53_s30, 16  ;;  %s2100_s17 = scalar_lea.vmem %s53_s30, 32 }
   0x9   :  { %p2097_p0 = scmp.ne.s32.totalorder %s53_s30, %s2096_s16  ;;  %p2101_p1 = scmp.lt.s32.totalorder %s53_s30, %s53_s30 }
   0xa   :  { %p2102_p2 = scmp.lt.s32.totalorder %s2100_s17, %s2096_s16 }
   0xc   :  { %p2103_p3 = por %p2102_p2, %p2101_p1 }
   0xe   :  { %p2104_p4 = pnand %p2103_p3, %p2097_p0 }
  0x10   :  { %2107 = shalt.err (!%p2104_p4)
}
  0x11   :  { %55 = dma.hbm_to_vmem [thread:$0]  %s3701_s6, 16, %s53_s30, [#allocation7]  }
  0x12   :  { %s2116_s18 = scalar_lea.vmem %s73_s15, 16  ;;  %s2120_s19 = scalar_lea.vmem %s73_s15, 32 }
  0x13   :  { %p2117_p5 = scmp.ne.s32.totalorder %s73_s15, %s2116_s18  ;;  %p2121_p6 = scmp.lt.s32.totalorder %s73_s15, %s73_s15 }
  0x14   :  { %p2122_p7 = scmp.lt.s32.totalorder %s2120_s19, %s2116_s18 }
  0x16   :  { %p2123_p8 = por %p2122_p7, %p2121_p6 }
  0x18   :  { %p2124_p9 = pnand %p2123_p8, %p2117_p5 }
  0x1a   :  { %2127 = shalt.err (!%p2124_p9)
}
  0x1b   :  { %75 = dma.hbm_to_vmem [thread:$0]  %s3703_s8, 16, %s73_s15, [#allocation10]  }
  0x1c   :  { %s2218_s22 = smov [#allocation4]   ;;  %s2219_s24 = smov [#allocation8]  }
  0x1d   :  { %s42_s23 = sshll.u32 %s2218_s22, 4  ;;  %s62_s25 = sshll.u32 %s2219_s24, 4  ;;  %s43_s23 = int_to_ptr.vmem [resolvable:$true] %s42_s23  ;;  %s63_s25 = int_to_ptr.vmem [resolvable:$true] %s62_s25 }
  0x1e   :  { %s2136_s26 = scalar_lea.vmem %s43_s23, 16  ;;  %s2140_s6 = scalar_lea.vmem %s43_s23, 32 }
  0x1f   :  { %p2137_p10 = scmp.ne.s32.totalorder %s43_s23, %s2136_s26  ;;  %p2141_p11 = scmp.lt.s32.totalorder %s43_s23, %s43_s23 }
  0x20   :  { %p2142_p12 = scmp.lt.s32.totalorder %s2140_s6, %s2136_s26 }
  0x22   :  { %p2143_p13 = por %p2142_p12, %p2141_p11 }
  0x24   :  { %p2144_p0 = pnand %p2143_p13, %p2137_p10 }
  0x26   :  { %2147 = shalt.err (!%p2144_p0)
}
  0x27   :  { %45 = dma.hbm_to_vmem [thread:$0]  %s3700_s5, 16, %s43_s23, [#allocation5]  }
  0x28   :  { %s2156_s29 = scalar_lea.vmem %s63_s25, 16  ;;  %s2160_s8 = scalar_lea.vmem %s63_s25, 32 }
  0x29   :  { %p2157_p1 = scmp.ne.s32.totalorder %s63_s25, %s2156_s29  ;;  %p2161_p2 = scmp.lt.s32.totalorder %s63_s25, %s63_s25 }
  0x2a   :  { %p2162_p3 = scmp.lt.s32.totalorder %s2160_s8, %s2156_s29 }
  0x2c   :  { %p2163_p4 = por %p2162_p3, %p2161_p2 }
  0x2e   :  { %p2164_p5 = pnand %p2163_p4, %p2157_p1 }
  0x30   :  { %2167 = shalt.err (!%p2164_p5)
}
  0x31   :  { %65 = dma.hbm_to_vmem [thread:$0]  %s3702_s7, 16, %s63_s25, [#allocation7]  }
  0x32   :  { %s2220_s15 = smov [#allocation11]   ;;  %s2221_s17 = smov [#allocation12]  }
  0x33   :  { %s82_s16 = sshll.u32 %s2220_s15, 4  ;;  %s92_s11 = sshll.u32 %s2221_s17, 4  ;;  %s83_s16 = int_to_ptr.vmem [resolvable:$true] %s82_s16  ;;  %s93_s11 = int_to_ptr.vmem [resolvable:$true] %s92_s11 }
  0x34   :  { %s2176_s12 = scalar_lea.vmem %s83_s16, 16  ;;  %s2180_s5 = scalar_lea.vmem %s83_s16, 32 }
  0x35   :  { %p2177_p6 = scmp.ne.s32.totalorder %s83_s16, %s2176_s12  ;;  %p2181_p7 = scmp.lt.s32.totalorder %s83_s16, %s83_s16 }
  0x36   :  { %p2182_p8 = scmp.lt.s32.totalorder %s2180_s5, %s2176_s12 }
  0x38   :  { %p2183_p9 = por %p2182_p8, %p2181_p7 }
  0x3a   :  { %p2184_p10 = pnand %p2183_p9, %p2177_p6 }
  0x3c   :  { %2187 = shalt.err (!%p2184_p10)
}
  0x3d   :  { %85 = dma.hbm_to_vmem [thread:$0]  %s3704_s9, 16, %s83_s16, [#allocation10]  }
  0x3e   :  { %s2196_s20 = scalar_lea.vmem %s93_s11, 16  ;;  %s2200_s7 = scalar_lea.vmem %s93_s11, 32 }
  0x3f   :  { %p2197_p11 = scmp.ne.s32.totalorder %s93_s11, %s2196_s20  ;;  %p2201_p12 = scmp.lt.s32.totalorder %s93_s11, %s93_s11 }
  0x40   :  { %p2202_p13 = scmp.lt.s32.totalorder %s2200_s7, %s2196_s20 }
  0x42   :  { %p2203_p0 = por %p2202_p13, %p2201_p12 }
  0x44   :  { %p2204_p1 = pnand %p2203_p0, %p2197_p11 }
  0x46   :  { %2207 = shalt.err (!%p2204_p1)
}
  0x47   :  { %95 = dma.hbm_to_vmem [thread:$0]  %s3705_s10, 16, %s93_s11, [#allocation13]  }
  0x48   :  { %2208 = dma.done.wait [#allocation5], 16  }
  0x49   :  { %2209 = vsyncadd [#allocation5], 4294967280 }
  0x4a   :  { %2210 = dma.done.wait [#allocation7], 32  }
  0x4b   :  { %2211 = vsyncadd [#allocation7], 4294967264 }
  0x4c   :  { %2212 = dma.done.wait [#allocation10], 32  }
  0x4d   :  { %2213 = vsyncadd [#allocation10], 4294967264 }
  0x4e   :  { %2214 = dma.done.wait [#allocation13], 16  }
  0x4f   :  { %2215 = vsyncadd [#allocation13], 4294967280  ;;  %v2222_v2 = vmov 0   ;;  %vm160_vm0 = vcmask 1044480   ;;  %v2021_v5 = vld [vmem:[%s3695_s0] sm:$0xff]   ;;  %vm153_vm1 = vcmask 80896  }
  0x50   :  { %205 = vmatprep.mubr.bf16.mxu0 %v2222_v2  ;;  %258 = vmatprep.mubr.bf16.mxu1 %v2222_v2  ;;  %v2018_v3 = vld [vmem:[%s3696_s1 + $0x4] ss:$16 sps:$4 sm:$0x1f]   ;;  %v2020_v4 = vld [vmem:[%s3696_s1] ss:$16 sps:$4 sm:$0x1f]  }
  0x51   :  { %2016 = vset.pattern.permute.xlu0 %v2222_v2  ;;  %2017 = vset.pattern.permute.xlu1 %v2222_v2  ;;  %v162_v6 = vsel %vm160_vm0, %v2020_v4, 0  ;;  %v2022_v7 = vld [vmem:[%s3696_s1 + $0xc] ss:$16 sps:$4 sm:$0x1f]   ;;  %v2026_v12 = vld [vmem:[%s3697_s2 + $0x70] ss:$8 sps:$4 sm:$0xff]  }
  0x52   :  { %1925 = vmatprep.subr.msk.bf16.mxu0 %vm160_vm0, %v2018_v3  ;;  %v2024_v8 = vld [vmem:[%s3696_s1 + $0x8] ss:$16 sps:$4 sm:$0x1f]   ;;  %1928 = vmatprep.subr.msk.bf16.mxu1 %vm160_vm0, %v2022_v7  ;;  %v2028_v11 = vld [vmem:[%s3697_s2 + $0x74] ss:$8 sps:$4 sm:$0xff]   ;;  %vm762_vm2 = vcmask 523264  }
  0x53   :  { %188 = vmatpush1.bf16.msra.mxu0 %v162_v6  ;;  %v168_v9 = vsel %vm160_vm0, %v2024_v8, 0  ;;  %v2025_v10 = vld [vmem:[%s3695_s0 + $0x8] sm:$0xff]   ;;  %v2034_v15 = vld [vmem:[%s3697_s2 + $0x54] ss:$8 sps:$4 sm:$0xff]   ;;  %v2032_v16 = vld [vmem:[%s3697_s2 + $0x50] ss:$8 sps:$4 sm:$0xff]  }
  0x54   :  { %241 = vmatpush1.bf16.msra.mxu1 %v168_v9  ;;  %513 = vmatprep.subr.bf16.mxu0 %v2028_v11  ;;  %v2031_v13 = vld [vmem:[%s3697_s2 + $0x64] ss:$8 sps:$4 sm:$0xff]   ;;  %v2029_v14 = vld [vmem:[%s3697_s2 + $0x60] ss:$8 sps:$4 sm:$0xff]   ;;  %v2040_v19 = vld [vmem:[%s3697_s2 + $0x34] ss:$8 sps:$4 sm:$0xff]  }
  0x55   :  { %v2037_v17 = vld [vmem:[%s3697_s2 + $0x44] ss:$8 sps:$4 sm:$0xff]   ;;  %v2035_v18 = vld [vmem:[%s3697_s2 + $0x40] ss:$8 sps:$4 sm:$0xff]   ;;  %v2038_v20 = vld [vmem:[%s3697_s2 + $0x30] ss:$8 sps:$4 sm:$0xff]  }
  0x56   :  { %1926 = vmatmul.mubr.msk.bf16.vlgmr.msra.gmra.mxu0 %vm153_vm1, %v2021_v5  ;;  %v2043_v21 = vld [vmem:[%s3697_s2 + $0x24] ss:$8 sps:$4 sm:$0xff]   ;;  %v2041_v22 = vld [vmem:[%s3697_s2 + $0x20] ss:$8 sps:$4 sm:$0xff]   ;;  %v2046_v23 = vld [vmem:[%s3697_s2 + $0x14] ss:$8 sps:$4 sm:$0xff]  }
  0x57   :  { %215 = vmatprep.mubr.bf16.mxu0 %v2222_v2  ;;  %1929 = vmatmul.mubr.msk.bf16.vlgmr.msra.gmra.mxu1 %vm153_vm1, %v2021_v5  ;;  %v2044_v24 = vld [vmem:[%s3697_s2 + $0x10] ss:$8 sps:$4 sm:$0xff]   ;;  %v2047_v25 = vld [vmem:[%s3697_s2] ss:$8 sps:$4 sm:$0xff]   ;;  %v2049_v26 = vld [vmem:[%s3697_s2 + $0x4] ss:$8 sps:$4 sm:$0xff]  }
  0x58   :  { %268 = vmatprep.mubr.bf16.mxu1 %v2222_v2  ;;  %514 = vmatpush1.bf16.msra.mxu0 %v2026_v12  ;;  %s2223_s2 = smov 64   ;;  %s2225_s19 = smov 32   ;;  %vm1474_vm3 = vcmask 261120   ;;  %vm1477_vm4 = vcmask 785408  }
  0x59   :  { %515 = vmatprep.subr.bf16.mxu0 %v2031_v13  ;;  %s2226_s28 = smov 0.0  }
  0x5c   :  { %516 = vmatpush1.bf16.msra.mxu0 %v2029_v14 }
  0x5d   :  { %517 = vmatprep.subr.bf16.mxu0 %v2034_v15 }
  0x5e   :  { %1927 = vmatmul.mubr.msk.bf16.gmra.mxu0 %vm153_vm1, %v2025_v10 }
  0x5f   :  { %545 = vmatprep.mubr.bf16.mxu0 %v2222_v2  ;;  %1930 = vmatmul.mubr.msk.bf16.gmra.mxu1 %vm153_vm1, %v2025_v10 }
  0x60   :  { %1021 = vmatprep.mubr.bf16.mxu1 %v2222_v2  ;;  %518 = vmatpush1.bf16.msra.mxu0 %v2032_v16 }
  0x61   :  { %519 = vmatprep.subr.bf16.mxu0 %v2037_v17 }
  0x64   :  { %520 = vmatpush1.bf16.msra.mxu0 %v2035_v18 }
  0x65   :  { %521 = vmatprep.subr.bf16.mxu0 %v2040_v19 }
  0x68   :  { %522 = vmatpush1.bf16.msra.mxu0 %v2038_v20 }
  0x69   :  { %523 = vmatprep.subr.bf16.mxu0 %v2043_v21 }
  0x6c   :  { %524 = vmatpush1.bf16.msra.mxu0 %v2041_v22 }
  0x6d   :  { %525 = vmatprep.subr.bf16.mxu0 %v2046_v23 }
  0x70   :  { %526 = vmatpush1.bf16.msra.mxu0 %v2044_v24 }
  0x71   :  { %527 = vmatprep.subr.bf16.mxu0 %v2049_v26 }
  0x74   :  { %528 = vmatpush1.bf16.msra.mxu0 %v2047_v25 }
 0x116   :  { %v2395_v27 = vpop.f32.mrf.mxu0 }
 0x117   :  { %v2401_v30 = vpop.f32.mrf.mxu1  ;;  %v302_v35 = vmul.f32 %v2395_v27, %v2395_v27 }
 0x118   :  { %v2397_v28 = vpop.f32.mrf.mxu0  ;;  %v310_v61 = vmul.f32 %v2401_v30, %v2401_v30 }
 0x119   :  { %v2409_v34 = vpop.f32.mrf.mxu1  ;;  %v306_v46 = vmul.f32 %v2397_v28, %v2397_v28 }
 0x11a   :  { %v2399_v29 = vpop.f32.mrf.mxu0  ;;  %v314_v12 = vmul.f32 %v2409_v34, %v2409_v34 }
 0x11b   :  { %v303_v32 = vmul.f32 %v2399_v29, %v2399_v29  ;;  %v281_v36 = vadd.f32 %v2399_v29, %v2395_v27  ;;  %v2422_v42 = vpop.f32.mrf.mxu1 }
 0x11c   :  { %v2403_v31 = vpop.f32.mrf.mxu0  ;;  %v311_v3 = vmul.f32 %v2422_v42, %v2422_v42 }
 0x11d   :  { %v318_v39 = vadd.f32 %v303_v32, %v302_v35  ;;  %v2430_v49 = vpop.f32.mrf.mxu1  ;;  %v307_v50 = vmul.f32 %v2403_v31, %v2403_v31 }
 0x11e   :  { %v2407_v33 = vpop.f32.mrf.mxu0  ;;  %v315_v15 = vmul.f32 %v2430_v49, %v2430_v49 }
 0x11f   :  { %v304_v37 = vmul.f32 %v2407_v33, %v2407_v33  ;;  %v282_v40 = vadd.f32 %v281_v36, %v2407_v33  ;;  %v2440_v57 = vpop.f32.mrf.mxu1 }
 0x120   :  { %v2417_v38 = vpop.f32.mrf.mxu0  ;;  %v312_v7 = vmul.f32 %v2440_v57, %v2440_v57 }
 0x121   :  { %v319_v43 = vadd.f32 %v318_v39, %v304_v37  ;;  %v308_v54 = vmul.f32 %v2417_v38, %v2417_v38  ;;  %v2448_v0 = vpop.f32.mrf.mxu1 }
 0x122   :  { %v2420_v41 = vpop.f32.mrf.mxu0  ;;  %v316_v19 = vmul.f32 %v2448_v0, %v2448_v0 }
 0x123   :  { %v283_v44 = vadd.f32 %v282_v40, %v2420_v41  ;;  %v305_v45 = vmul.f32 %v2420_v41, %v2420_v41  ;;  %v2456_v8 = vpop.f32.mrf.mxu1 }
 0x124   :  { %v2435_v53 = vpop.f32.mrf.mxu0  ;;  %v313_v11 = vmul.f32 %v2456_v8, %v2456_v8 }
 0x125   :  { %v284_v47 = vadd.f32 %v283_v44, %v2397_v28  ;;  %v320_v48 = vadd.f32 %v319_v43, %v305_v45  ;;  %v309_v59 = vmul.f32 %v2435_v53, %v2435_v53  ;;  %v2467_v18 = vpop.f32.mrf.mxu1 }
 0x126   :  { %v317_v23 = vmul.f32 %v2467_v18, %v2467_v18 }
 0x127   :  { %v321_v51 = vadd.f32 %v320_v48, %v306_v46  ;;  %v285_v52 = vadd.f32 %v284_v47, %v2403_v31 }
 0x129   :  { %v286_v55 = vadd.f32 %v285_v52, %v2417_v38  ;;  %v322_v56 = vadd.f32 %v321_v51, %v307_v50 }
 0x12b   :  { %v287_v58 = vadd.f32 %v286_v55, %v2435_v53  ;;  %v323_v60 = vadd.f32 %v322_v56, %v308_v54  ;;  %v350_v56 = vlaneseq }
 0x12d   :  { %v324_v62 = vadd.f32 %v323_v60, %v309_v59  ;;  %v288_v63 = vadd.f32 %v287_v58, %v2401_v30  ;;  %v351_v58 = vshrl.u32 %v350_v56, 7  ;;  %v279_v59 = vld [vmem:[#allocation4] sm:$0x1] }
 0x12f   :  { %v289_v1 = vadd.f32 %v288_v63, %v2422_v42  ;;  %v325_v4 = vadd.f32 %v324_v62, %v310_v61  ;;  %v2475_v60 = vsub.s32 0, %v351_v58  ;;  %v280_v63 = vld [vmem:[#allocation6] sm:$0x1] }
 0x131   :  { %v326_v5 = vadd.f32 %v325_v4, %v311_v3  ;;  %v290_v6 = vadd.f32 %v289_v1, %v2440_v57 }
 0x133   :  { %v327_v9 = vadd.f32 %v326_v5, %v312_v7  ;;  %v291_v10 = vadd.f32 %v290_v6, %v2456_v8 }
 0x135   :  { %v292_v13 = vadd.f32 %v291_v10, %v2409_v34  ;;  %v328_v14 = vadd.f32 %v327_v9, %v313_v11 }
 0x137   :  { %v329_v16 = vadd.f32 %v328_v14, %v314_v12  ;;  %v293_v17 = vadd.f32 %v292_v13, %v2430_v49 }
 0x139   :  { %v294_v20 = vadd.f32 %v293_v17, %v2448_v0  ;;  %v330_v21 = vadd.f32 %v329_v16, %v315_v15 }
 0x13b   :  { %v295_v22 = vadd.f32 %v294_v20, %v2467_v18  ;;  %v331_v24 = vadd.f32 %v330_v21, %v316_v19 }
 0x13d   :  { %v296_v25 = vrot.slane %v295_v22, 4  ;;  %v332_v26 = vadd.f32 %v331_v24, %v317_v23 }
 0x13f   :  { %v297_v32 = vadd.f32 %v296_v25, %v295_v22  ;;  %v333_v35 = vrot.slane %v332_v26, 4 }
 0x141   :  { %v298_v36 = vrot.slane %v297_v32, 2  ;;  %v334_v37 = vadd.f32 %v333_v35, %v332_v26 }
 0x143   :  { %v299_v39 = vadd.f32 %v298_v36, %v297_v32  ;;  %v335_v40 = vrot.slane %v334_v37, 2 }
 0x145   :  { %v300_v43 = vrot.slane %v299_v39, 1  ;;  %v336_v44 = vadd.f32 %v335_v40, %v334_v37 }
 0x147   :  { %v301_v45 = vadd.f32 %v300_v43, %v299_v39  ;;  %v337_v46 = vrot.slane %v336_v44, 1 }
 0x149   :  { %v338_v47 = vadd.f32 %v337_v46, %v336_v44  ;;  %v339_v48 = vmul.f32 0.0078125, %v301_v45 }
 0x14b   :  { %v340_v50 = vmul.f32 0.0078125, %v338_v47  ;;  %v341_v51 = vmul.f32 %v339_v48, %v339_v48 }
 0x14d   :  { %v342_v52 = vsub.f32 %v340_v50, %v341_v51 }
 0x14f   :  { %v343_v54 = vmax.f32 %v342_v52, 0.0 }
 0x151   :  { %v344_v55 = vadd.f32 1e-05, %v343_v54 }
 0x153   :  { %2080 = vrsqrt.f32 %v344_v55 }
 0x160   :  { %v2081_v61 = vpop.eup %2080 }
 0x161   :  { %v346_v62 = vmul.f32 %v2081_v61, %v279_v59 }
 0x163   :  { %v347_v1 = vmul.f32 %v346_v62, %v339_v48  ;;  %v2478_v3 = vrot.slane %v346_v62, %v2475_v60 }
 0x165   :  { %v348_v4 = vsub.f32 %v280_v63, %v347_v1  ;;  %v355_v6 = vmul.f32 %v2478_v3, %v2395_v27  ;;  %v356_v7 = vmul.f32 %v2478_v3, %v2399_v29  ;;  %v357_v13 = vmul.f32 %v2478_v3, %v2407_v33 }
 0x166   :  { %v358_v14 = vmul.f32 %v2478_v3, %v2420_v41  ;;  %v359_v19 = vmul.f32 %v2478_v3, %v2397_v28  ;;  %v360_v20 = vmul.f32 %v2478_v3, %v2403_v31  ;;  %v361_v24 = vmul.f32 %v2478_v3, %v2417_v38 }
 0x167   :  { %v2481_v5 = vrot.slane %v348_v4, %v2475_v60  ;;  %v362_v25 = vmul.f32 %v2478_v3, %v2435_v53  ;;  %v363_v36 = vmul.f32 %v2478_v3, %v2401_v30  ;;  %v364_v37 = vmul.f32 %v2478_v3, %v2422_v42 }
 0x168   :  { %v365_v44 = vmul.f32 %v2478_v3, %v2440_v57  ;;  %v366_v45 = vmul.f32 %v2478_v3, %v2456_v8  ;;  %v367_v50 = vmul.f32 %v2478_v3, %v2409_v34  ;;  %v368_v51 = vmul.f32 %v2478_v3, %v2430_v49 }
 0x169   :  { %v377_v9 = vadd.f32 %v2481_v5, %v355_v6  ;;  %v378_v10 = vadd.f32 %v2481_v5, %v356_v7  ;;  %v379_v16 = vadd.f32 %v2481_v5, %v357_v13  ;;  %v380_v27 = vadd.f32 %v2481_v5, %v358_v14 }
 0x16a   :  { %v381_v21 = vadd.f32 %v2481_v5, %v359_v19  ;;  %v382_v41 = vadd.f32 %v2481_v5, %v360_v20  ;;  %v383_v26 = vadd.f32 %v2481_v5, %v361_v24  ;;  %v384_v31 = vadd.f32 %v2481_v5, %v362_v25 }
 0x16b   :  { %v393_v11 = vmax.f32 %v377_v9, 0.0  ;;  %v394_v12 = vmax.f32 %v378_v10, 0.0  ;;  %v395_v29 = vmax.f32 %v379_v16, 0.0  ;;  %v396_v17 = vmax.f32 %v380_v27, 0.0 }
 0x16c   :  { %v397_v22 = vmax.f32 %v381_v21, 0.0  ;;  %v398_v23 = vmax.f32 %v382_v41, 0.0  ;;  %v399_v32 = vmax.f32 %v383_v26, 0.0  ;;  %v400_v35 = vmax.f32 %v384_v31, 0.0 }
 0x16d   :  { %v409_v15 = vpack.c.bf16 %v394_v12, %v393_v11  ;;  %v410_v33 = vpack.c.bf16 %v396_v17, %v395_v29  ;;  %v385_v39 = vadd.f32 %v2481_v5, %v363_v36  ;;  %v386_v53 = vadd.f32 %v2481_v5, %v364_v37 }
 0x16e   :  { %v411_v28 = vpack.c.bf16 %v398_v23, %v397_v22  ;;  %v412_v38 = vpack.c.bf16 %v400_v35, %v399_v32  ;;  %v387_v46 = vadd.f32 %v2481_v5, %v365_v44  ;;  %v388_v42 = vadd.f32 %v2481_v5, %v366_v45 }
 0x16f   :  { %546 = vmatmul.mubr.bf16.vlgmr.msra.gmra.mxu0 %v409_v15  ;;  %v401_v40 = vmax.f32 %v385_v39, 0.0  ;;  %v402_v43 = vmax.f32 %v386_v53, 0.0  ;;  %v389_v52 = vadd.f32 %v2481_v5, %v367_v50  ;;  %v390_v8 = vadd.f32 %v2481_v5, %v368_v51 }
 0x170   :  { %555 = vmatprep.mubr.bf16.mxu0 %v2222_v2  ;;  %v403_v47 = vmax.f32 %v387_v46, 0.0  ;;  %v404_v48 = vmax.f32 %v388_v42, 0.0  ;;  %v370_v56 = vmul.f32 %v2478_v3, %v2467_v18  ;;  %v369_v58 = vmul.f32 %v2478_v3, %v2448_v0 }
 0x171   :  { %v413_v30 = vpack.c.bf16 %v402_v43, %v401_v40  ;;  %v405_v54 = vmax.f32 %v389_v52, 0.0  ;;  %v406_v55 = vmax.f32 %v390_v8, 0.0 }
 0x172   :  { %v414_v57 = vpack.c.bf16 %v404_v48, %v403_v47  ;;  %v392_v34 = vadd.f32 %v2481_v5, %v370_v56  ;;  %v391_v49 = vadd.f32 %v2481_v5, %v369_v58 }
 0x173   :  { %v415_v59 = vpack.c.bf16 %v406_v55, %v405_v54 }
 0x174   :  { %v407_v61 = vmax.f32 %v391_v49, 0.0  ;;  %v408_v62 = vmax.f32 %v392_v34, 0.0 }
 0x176   :  { %v416_v63 = vpack.c.bf16 %v408_v62, %v407_v61 }
 0x177   :  { %556 = vmatmul.mubr.bf16.gmra.mxu0 %v410_v33 }
 0x178   :  { %565 = vmatprep.mubr.bf16.mxu0 %v2222_v2 }
 0x17f   :  { %566 = vmatmul.mubr.bf16.gmra.mxu0 %v411_v28 }
 0x180   :  { %575 = vmatprep.mubr.bf16.mxu0 %v2222_v2 }
 0x187   :  { %576 = vmatmul.mubr.bf16.gmra.mxu0 %v412_v38 }
 0x188   :  { %585 = vmatprep.mubr.bf16.mxu0 %v2222_v2 }
 0x18f   :  { %586 = vmatmul.mubr.bf16.gmra.mxu0 %v413_v30 }
 0x190   :  { %595 = vmatprep.mubr.bf16.mxu0 %v2222_v2 }
 0x197   :  { %596 = vmatmul.mubr.bf16.gmra.mxu0 %v414_v57 }
 0x198   :  { %605 = vmatprep.mubr.bf16.mxu0 %v2222_v2 }
 0x19f   :  { %606 = vmatmul.mubr.bf16.gmra.mxu0 %v415_v59 }
 0x1a0   :  { %615 = vmatprep.mubr.bf16.mxu0 %v2222_v2 }
 0x1a7   :  { %616 = vmatmul.mubr.bf16.gmra.mxu0 %v416_v63 }
 0x22f   :  { %v2538_v1 = vpop.f32.mrf.mxu0 }
 0x230   :  { %v665_v17 = vmul.f32 %v2538_v1, %v2538_v1 }
 0x231   :  { %v2540_v4 = vpop.f32.mrf.mxu0 }
 0x233   :  { %v2542_v18 = vpop.f32.mrf.mxu0 }
 0x234   :  { %v666_v27 = vmul.f32 %v2542_v18, %v2542_v18  ;;  %v628_v19 = vadd.f32 %v2542_v18, %v2538_v1 }
 0x235   :  { %v2544_v6 = vpop.f32.mrf.mxu0 }
 0x236   :  { %v697_v21 = vadd.f32 %v666_v27, %v665_v17 }
 0x237   :  { %v2546_v0 = vpop.f32.mrf.mxu0 }
 0x238   :  { %v667_v20 = vmul.f32 %v2546_v0, %v2546_v0  ;;  %v629_v41 = vadd.f32 %v628_v19, %v2546_v0 }
 0x239   :  { %v2548_v3 = vpop.f32.mrf.mxu0 }
 0x23a   :  { %v698_v24 = vadd.f32 %v697_v21, %v667_v20 }
 0x23b   :  { %v2550_v5 = vpop.f32.mrf.mxu0 }
 0x23c   :  { %v668_v22 = vmul.f32 %v2550_v5, %v2550_v5  ;;  %v630_v25 = vadd.f32 %v629_v41, %v2550_v5 }
 0x23d   :  { %v2552_v7 = vpop.f32.mrf.mxu0 }
 0x23e   :  { %v699_v31 = vadd.f32 %v698_v24, %v668_v22 }
 0x23f   :  { %v2554_v9 = vpop.f32.mrf.mxu0 }
 0x240   :  { %v669_v28 = vmul.f32 %v2554_v9, %v2554_v9  ;;  %v631_v32 = vadd.f32 %v630_v25, %v2554_v9 }
 0x241   :  { %v2556_v10 = vpop.f32.mrf.mxu0 }
 0x242   :  { %v700_v37 = vadd.f32 %v699_v31, %v669_v28 }
 0x243   :  { %v2558_v11 = vpop.f32.mrf.mxu0 }
 0x244   :  { %v670_v35 = vmul.f32 %v2558_v11, %v2558_v11  ;;  %v632_v38 = vadd.f32 %v631_v32, %v2558_v11 }
 0x245   :  { %v2560_v12 = vpop.f32.mrf.mxu0 }
 0x246   :  { %v701_v40 = vadd.f32 %v700_v37, %v670_v35 }
 0x247   :  { %v2562_v13 = vpop.f32.mrf.mxu0 }
 0x248   :  { %v671_v39 = vmul.f32 %v2562_v13, %v2562_v13  ;;  %v633_v43 = vadd.f32 %v632_v38, %v2562_v13  ;;  %v681_v38 = vmul.f32 %v2540_v4, %v2540_v4 }
 0x249   :  { %v2564_v14 = vpop.f32.mrf.mxu0 }
 0x24a   :  { %v702_v30 = vadd.f32 %v701_v40, %v671_v39 }
 0x24b   :  { %v2566_v15 = vpop.f32.mrf.mxu0 }
 0x24c   :  { %v672_v44 = vmul.f32 %v2566_v15, %v2566_v15  ;;  %v634_v46 = vadd.f32 %v633_v43, %v2566_v15  ;;  %v682_v43 = vmul.f32 %v2544_v6, %v2544_v6 }
 0x24d   :  { %v2568_v16 = vpop.f32.mrf.mxu0 }
 0x24e   :  { %v703_v48 = vadd.f32 %v702_v30, %v672_v44 }
 0x24f   :  { %v2572_v29 = vpop.f32.mrf.mxu0 }
 0x250   :  { %v673_v42 = vmul.f32 %v2572_v29, %v2572_v29  ;;  %v635_v50 = vadd.f32 %v634_v46, %v2572_v29  ;;  %v683_v46 = vmul.f32 %v2548_v3, %v2548_v3 }
 0x251   :  { %v2580_v33 = vpop.f32.mrf.mxu0 }
 0x252   :  { %v704_v52 = vadd.f32 %v703_v48, %v673_v42 }
 0x253   :  { %v2585_v23 = vpop.f32.mrf.mxu0 }
 0x254   :  { %v674_v51 = vmul.f32 %v2585_v23, %v2585_v23  ;;  %v636_v8 = vadd.f32 %v635_v50, %v2585_v23  ;;  %v684_v50 = vmul.f32 %v2552_v7, %v2552_v7 }
 0x255   :  { %v2590_v26 = vpop.f32.mrf.mxu0 }
 0x256   :  { %v705_v56 = vadd.f32 %v704_v52, %v674_v51 }
 0x257   :  { %v2595_v36 = vpop.f32.mrf.mxu0 }
 0x258   :  { %v675_v54 = vmul.f32 %v2595_v36, %v2595_v36  ;;  %v637_v58 = vadd.f32 %v636_v8, %v2595_v36  ;;  %v685_v8 = vmul.f32 %v2556_v10, %v2556_v10 }
 0x259   :  { %v2600_v53 = vpop.f32.mrf.mxu0 }
 0x25a   :  { %v706_v49 = vadd.f32 %v705_v56, %v675_v54 }
 0x25b   :  { %v2605_v45 = vpop.f32.mrf.mxu0 }
 0x25c   :  { %v676_v34 = vmul.f32 %v2605_v45, %v2605_v45  ;;  %v638_v61 = vadd.f32 %v637_v58, %v2605_v45  ;;  %v686_v58 = vmul.f32 %v2560_v12, %v2560_v12 }
 0x25d   :  { %v2610_v47 = vpop.f32.mrf.mxu0 }
 0x25e   :  { %v707_v27 = vadd.f32 %v706_v49, %v676_v34 }
 0x25f   :  { %v2615_v57 = vpop.f32.mrf.mxu0 }
 0x260   :  { %v677_v62 = vmul.f32 %v2615_v57, %v2615_v57  ;;  %v639_v17 = vadd.f32 %v638_v61, %v2615_v57  ;;  %v687_v61 = vmul.f32 %v2564_v14, %v2564_v14 }
 0x261   :  { %v2620_v55 = vpop.f32.mrf.mxu0 }
 0x262   :  { %v708_v21 = vadd.f32 %v707_v27, %v677_v62 }
 0x263   :  { %v2625_v59 = vpop.f32.mrf.mxu0 }
 0x264   :  { %v678_v19 = vmul.f32 %v2625_v59, %v2625_v59  ;;  %v640_v41 = vadd.f32 %v639_v17, %v2625_v59  ;;  %v688_v17 = vmul.f32 %v2568_v16, %v2568_v16 }
 0x265   :  { %v2630_v63 = vpop.f32.mrf.mxu0 }
 0x266   :  { %v709_v25 = vadd.f32 %v708_v21, %v678_v19 }
 0x267   :  { %v2635_v20 = vpop.f32.mrf.mxu0 }
 0x268   :  { %v679_v22 = vmul.f32 %v2635_v20, %v2635_v20  ;;  %v641_v28 = vadd.f32 %v640_v41, %v2635_v20  ;;  %v689_v41 = vmul.f32 %v2580_v33, %v2580_v33 }
 0x269   :  { %v2640_v24 = vpop.f32.mrf.mxu0 }
 0x26a   :  { %v710_v32 = vadd.f32 %v709_v25, %v679_v22 }
 0x26b   :  { %v2643_v31 = vpop.f32.mrf.mxu0 }
 0x26c   :  { %v642_v35 = vadd.f32 %v641_v28, %v2643_v31  ;;  %v680_v37 = vmul.f32 %v2643_v31, %v2643_v31  ;;  %v690_v28 = vmul.f32 %v2590_v26, %v2590_v26 }
 0x26e   :  { %v643_v39 = vadd.f32 %v642_v35, %v2540_v4  ;;  %v711_v40 = vadd.f32 %v710_v32, %v680_v37  ;;  %v691_v37 = vmul.f32 %v2600_v53, %v2600_v53 }
 0x270   :  { %v644_v44 = vadd.f32 %v643_v39, %v2544_v6  ;;  %v712_v30 = vadd.f32 %v711_v40, %v681_v38  ;;  %v692_v40 = vmul.f32 %v2610_v47, %v2610_v47 }
 0x272   :  { %v645_v42 = vadd.f32 %v644_v44, %v2548_v3  ;;  %v713_v48 = vadd.f32 %v712_v30, %v682_v43  ;;  %v693_v30 = vmul.f32 %v2620_v55, %v2620_v55 }
 0x274   :  { %v646_v51 = vadd.f32 %v645_v42, %v2552_v7  ;;  %v714_v52 = vadd.f32 %v713_v48, %v683_v46  ;;  %v694_v48 = vmul.f32 %v2630_v63, %v2630_v63 }
 0x276   :  { %v647_v54 = vadd.f32 %v646_v51, %v2556_v10  ;;  %v715_v56 = vadd.f32 %v714_v52, %v684_v50  ;;  %v2690_v52 = vpop.f32.mrf.mxu0 }
 0x278   :  { %v648_v34 = vadd.f32 %v647_v54, %v2560_v12  ;;  %v716_v49 = vadd.f32 %v715_v56, %v685_v8  ;;  %v695_v8 = vmul.f32 %v2640_v24, %v2640_v24 }
 0x27a   :  { %v649_v62 = vadd.f32 %v648_v34, %v2564_v14  ;;  %v717_v27 = vadd.f32 %v716_v49, %v686_v58  ;;  %v696_v34 = vmul.f32 %v2690_v52, %v2690_v52 }
 0x27c   :  { %v718_v19 = vadd.f32 %v717_v27, %v687_v61  ;;  %v650_v21 = vadd.f32 %v649_v62, %v2568_v16 }
 0x27e   :  { %v651_v22 = vadd.f32 %v650_v21, %v2580_v33  ;;  %v719_v25 = vadd.f32 %v718_v19, %v688_v17 }
 0x280   :  { %v652_v32 = vadd.f32 %v651_v22, %v2590_v26  ;;  %v720_v35 = vadd.f32 %v719_v25, %v689_v41 }
 0x282   :  { %v653_v38 = vadd.f32 %v652_v32, %v2600_v53  ;;  %v721_v39 = vadd.f32 %v720_v35, %v690_v28 }
 0x284   :  { %v654_v43 = vadd.f32 %v653_v38, %v2610_v47  ;;  %v722_v44 = vadd.f32 %v721_v39, %v691_v37  ;;  %v2050_v38 = vld [vmem:[%s3698_s3 + $0x70] ss:$8 sps:$4 sm:$0xff]   ;;  %v2052_v39 = vld [vmem:[%s3698_s3 + $0x74] ss:$8 sps:$4 sm:$0xff]  }
 0x285   :  { %989 = vmatprep.subr.bf16.mxu1 %v2052_v39  ;;  %v2068_v39 = vld [vmem:[%s3698_s3 + $0x10] ss:$8 sps:$4 sm:$0xff]  }
 0x286   :  { %v655_v46 = vadd.f32 %v654_v43, %v2620_v55  ;;  %v723_v42 = vadd.f32 %v722_v44, %v692_v40  ;;  %v2055_v40 = vld [vmem:[%s3698_s3 + $0x64] ss:$8 sps:$4 sm:$0xff]   ;;  %990 = vmatpush1.bf16.msra.mxu1 %v2050_v38  ;;  %v2053_v43 = vld [vmem:[%s3698_s3 + $0x60] ss:$8 sps:$4 sm:$0xff]   ;;  %v2058_v44 = vld [vmem:[%s3698_s3 + $0x54] ss:$8 sps:$4 sm:$0xff]  }
 0x287   :  { %991 = vmatprep.subr.bf16.mxu1 %v2055_v40  ;;  %v2070_v38 = vld [vmem:[%s3698_s3 + $0x14] ss:$8 sps:$4 sm:$0xff]   ;;  %v2073_v40 = vld [vmem:[%s3698_s3 + $0x4] ss:$8 sps:$4 sm:$0xff]  }
 0x288   :  { %v656_v50 = vadd.f32 %v655_v46, %v2630_v63  ;;  %v724_v51 = vadd.f32 %v723_v42, %v693_v30  ;;  %v2056_v30 = vld [vmem:[%s3698_s3 + $0x50] ss:$8 sps:$4 sm:$0xff]   ;;  %v2061_v46 = vld [vmem:[%s3698_s3 + $0x44] ss:$8 sps:$4 sm:$0xff]   ;;  %v2059_v42 = vld [vmem:[%s3698_s3 + $0x40] ss:$8 sps:$4 sm:$0xff]  }
 0x28a   :  { %v657_v54 = vadd.f32 %v656_v50, %v2640_v24  ;;  %v725_v56 = vadd.f32 %v724_v51, %v694_v48  ;;  %992 = vmatpush1.bf16.msra.mxu1 %v2053_v43  ;;  %v2064_v48 = vld [vmem:[%s3698_s3 + $0x34] ss:$8 sps:$4 sm:$0xff]   ;;  %v2062_v50 = vld [vmem:[%s3698_s3 + $0x30] ss:$8 sps:$4 sm:$0xff]   ;;  %v2071_v43 = vld [vmem:[%s3698_s3] ss:$8 sps:$4 sm:$0xff]  }
 0x28b   :  { %993 = vmatprep.subr.bf16.mxu1 %v2058_v44 }
 0x28c   :  { %v658_v58 = vadd.f32 %v657_v54, %v2690_v52  ;;  %v726_v49 = vadd.f32 %v725_v56, %v695_v8 }
 0x28e   :  { %v659_v61 = vrot.slane %v658_v58, 4  ;;  %v727_v62 = vadd.f32 %v726_v49, %v696_v34  ;;  %994 = vmatpush1.bf16.msra.mxu1 %v2056_v30 }
 0x28f   :  { %995 = vmatprep.subr.bf16.mxu1 %v2061_v46 }
 0x290   :  { %v728_v27 = vrot.slane %v727_v62, 4  ;;  %v660_v17 = vadd.f32 %v659_v61, %v658_v58 }
 0x292   :  { %v729_v19 = vadd.f32 %v728_v27, %v727_v62  ;;  %v661_v21 = vrot.slane %v660_v17, 2  ;;  %996 = vmatpush1.bf16.msra.mxu1 %v2059_v42 }
 0x293   :  { %997 = vmatprep.subr.bf16.mxu1 %v2064_v48 }
 0x294   :  { %v662_v41 = vadd.f32 %v661_v21, %v660_v17  ;;  %v730_v22 = vrot.slane %v729_v19, 2  ;;  %v626_v17 = vld [vmem:[#allocation8] sm:$0x1] }
 0x296   :  { %v663_v25 = vrot.slane %v662_v41, 1  ;;  %v731_v28 = vadd.f32 %v730_v22, %v729_v19  ;;  %998 = vmatpush1.bf16.msra.mxu1 %v2062_v50  ;;  %v2065_v22 = vld [vmem:[%s3698_s3 + $0x20] ss:$8 sps:$4 sm:$0xff]  }
 0x298   :  { %v664_v32 = vadd.f32 %v663_v25, %v662_v41  ;;  %v732_v35 = vrot.slane %v731_v28, 1  ;;  %v627_v41 = vld [vmem:[#allocation9] sm:$0x1]  ;;  %v2067_v25 = vld [vmem:[%s3698_s3 + $0x24] ss:$8 sps:$4 sm:$0xff]   ;;  %s2224_s3 = smov 96  }
 0x299   :  { %999 = vmatprep.subr.bf16.mxu1 %v2067_v25 }
 0x29a   :  { %735 = vrot.lane.b32.xlu0 %v664_v32, %s2223_s2  ;;  %v733_v37 = vadd.f32 %v732_v35, %v731_v28  ;;  %1000 = vmatpush1.bf16.msra.mxu1 %v2065_v22 }
 0x29b   :  { %1001 = vmatprep.subr.bf16.mxu1 %v2070_v38 }
 0x29e   :  { %740 = vrot.lane.b32.xlu0 %v733_v37, %s2223_s2  ;;  %1002 = vmatpush1.bf16.msra.mxu1 %v2068_v39 }
 0x29f   :  { %1003 = vmatprep.subr.bf16.mxu1 %v2073_v40 }
 0x2a2   :  { %1004 = vmatpush1.bf16.msra.mxu1 %v2071_v43 }
 0x30c   :  { %v736_v51 = vpop.permute.xlu0 %735 }
 0x30d   :  { %v738_v8 = vadd.f32 %v736_v51, %v664_v32 }
 0x30f   :  { %v744_v54 = vmul.f32 0.001953125, %v738_v8 }
 0x310   :  { %v741_v56 = vpop.permute.xlu0 %740 }
 0x311   :  { %v743_v58 = vadd.f32 %v741_v56, %v733_v37  ;;  %v746_v34 = vmul.f32 %v744_v54, %v744_v54 }
 0x313   :  { %v745_v49 = vmul.f32 0.001953125, %v743_v58 }
 0x315   :  { %v747_v61 = vsub.f32 %v745_v49, %v746_v34 }
 0x317   :  { %v748_v62 = vmax.f32 %v747_v61, 0.0 }
 0x319   :  { %v749_v27 = vadd.f32 1e-05, %v748_v62 }
 0x31b   :  { %2082 = vrsqrt.f32 %v749_v27 }
 0x328   :  { %v2083_v19 = vpop.eup %2082 }
 0x329   :  { %v751_v21 = vmul.f32 %v2083_v19, %v626_v17 }
 0x32b   :  { %v758_v28 = vrot.slane %v751_v21, %v2475_v60  ;;  %v752_v32 = vmul.f32 %v751_v21, %v744_v54 }
 0x32d   :  { %759 = vrot.lane.b32.xlu1 %v758_v28, %s2223_s2  ;;  %v753_v35 = vsub.f32 %v627_v41, %v752_v32 }
 0x32f   :  { %v768_v37 = vrot.slane %v753_v35, %v2475_v60 }
 0x331   :  { %769 = vrot.lane.b32.xlu1 %v768_v37, %s2223_s2 }
 0x39f   :  { %v760_v44 = vpop.permute.xlu1 %759 }
 0x3a0   :  { %v763_v30 = vsel %vm762_vm2, %v751_v21, %v760_v44 }
 0x3a1   :  { %v2754_v46 = vrot.slane %v763_v30, %v2475_v60 }
 0x3a3   :  { %v770_v42 = vpop.permute.xlu1 %769  ;;  %v777_v48 = vmul.f32 %v2754_v46, %v2538_v1  ;;  %v778_v51 = vmul.f32 %v2754_v46, %v2542_v18  ;;  %v779_v8 = vmul.f32 %v2754_v46, %v2546_v0  ;;  %v780_v54 = vmul.f32 %v2754_v46, %v2550_v5 }
 0x3a4   :  { %v772_v50 = vsel %vm762_vm2, %v753_v35, %v770_v42  ;;  %v793_v56 = vmul.f32 %v2754_v46, %v2540_v4  ;;  %v794_v58 = vmul.f32 %v2754_v46, %v2544_v6  ;;  %v795_v1 = vmul.f32 %v2754_v46, %v2548_v3 }
 0x3a5   :  { %v796_v34 = vmul.f32 %v2754_v46, %v2552_v7  ;;  %v2774_v18 = vrot.slane %v772_v50, %v2475_v60  ;;  %v797_v0 = vmul.f32 %v2754_v46, %v2556_v10  ;;  %v798_v5 = vmul.f32 %v2754_v46, %v2560_v12 }
 0x3a6   :  { %v799_v4 = vmul.f32 %v2754_v46, %v2564_v14  ;;  %v800_v6 = vmul.f32 %v2754_v46, %v2568_v16  ;;  %v801_v3 = vmul.f32 %v2754_v46, %v2580_v33  ;;  %v802_v7 = vmul.f32 %v2754_v46, %v2590_v26 }
 0x3a7   :  { %v803_v49 = vmul.f32 %v2754_v46, %v2600_v53  ;;  %v804_v10 = vmul.f32 %v2754_v46, %v2610_v47  ;;  %v805_v12 = vmul.f32 %v2754_v46, %v2620_v55  ;;  %v806_v14 = vmul.f32 %v2754_v46, %v2630_v63 }
 0x3a8   :  { %v807_v16 = vmul.f32 %v2754_v46, %v2640_v24  ;;  %v808_v33 = vmul.f32 %v2754_v46, %v2690_v52  ;;  %v813_v26 = vadd.f32 %v2774_v18, %v777_v48  ;;  %v814_v61 = vadd.f32 %v2774_v18, %v778_v51 }
 0x3a9   :  { %v815_v53 = vadd.f32 %v2774_v18, %v779_v8  ;;  %v816_v47 = vadd.f32 %v2774_v18, %v780_v54  ;;  %v829_v62 = vadd.f32 %v2774_v18, %v793_v56  ;;  %v830_v55 = vadd.f32 %v2774_v18, %v794_v58 }
 0x3aa   :  { %v831_v63 = vadd.f32 %v2774_v18, %v795_v1  ;;  %v832_v27 = vadd.f32 %v2774_v18, %v796_v34  ;;  %v833_v24 = vadd.f32 %v2774_v18, %v797_v0  ;;  %v834_v52 = vadd.f32 %v2774_v18, %v798_v5 }
 0x3ab   :  { %v835_v17 = vadd.f32 %v2774_v18, %v799_v4  ;;  %v836_v19 = vadd.f32 %v2774_v18, %v800_v6  ;;  %v837_v21 = vadd.f32 %v2774_v18, %v801_v3  ;;  %v838_v41 = vadd.f32 %v2774_v18, %v802_v7 }
 0x3ac   :  { %v839_v22 = vadd.f32 %v2774_v18, %v803_v49  ;;  %v840_v25 = vadd.f32 %v2774_v18, %v804_v10  ;;  %v841_v28 = vadd.f32 %v2774_v18, %v805_v12  ;;  %v842_v32 = vadd.f32 %v2774_v18, %v806_v14 }
 0x3ad   :  { %v843_v35 = vadd.f32 %v2774_v18, %v807_v16  ;;  %v844_v37 = vadd.f32 %v2774_v18, %v808_v33  ;;  %v845_v38 = vmax.f32 %v813_v26, 0.0  ;;  %v846_v39 = vmax.f32 %v814_v61, 0.0 }
 0x3ae   :  { %v781_v43 = vmul.f32 %v2754_v46, %v2554_v9  ;;  %v847_v44 = vmax.f32 %v815_v53, 0.0  ;;  %v848_v30 = vmax.f32 %v816_v47, 0.0  ;;  %v782_v42 = vmul.f32 %v2754_v46, %v2558_v11 }
 0x3af   :  { %v877_v40 = vpack.c.bf16 %v846_v39, %v845_v38  ;;  %v861_v50 = vmax.f32 %v829_v62, 0.0  ;;  %v862_v51 = vmax.f32 %v830_v55, 0.0  ;;  %v863_v54 = vmax.f32 %v831_v63, 0.0 }
 0x3b0   :  { %v817_v48 = vadd.f32 %v2774_v18, %v781_v43  ;;  %v818_v8 = vadd.f32 %v2774_v18, %v782_v42  ;;  %v864_v56 = vmax.f32 %v832_v27, 0.0  ;;  %v865_v58 = vmax.f32 %v833_v24, 0.0 }
 0x3b1   :  { %1022 = vmatmul.mubr.bf16.vlgmr.msra.gmra.mxu1 %v877_v40  ;;  %v878_v1 = vpack.c.bf16 %v848_v30, %v847_v44  ;;  %v2827_v34 = vpack.c.bf16 %v862_v51, %v861_v50  ;;  %v866_v9 = vmax.f32 %v834_v52, 0.0  ;;  %v867_v0 = vmax.f32 %v835_v17, 0.0 }
 0x3b2   :  { %1031 = vmatprep.mubr.bf16.mxu1 %v2222_v2  ;;  %v2829_v5 = vpack.c.bf16 %v864_v56, %v863_v54  ;;  %v868_v11 = vmax.f32 %v836_v19, 0.0  ;;  %v869_v4 = vmax.f32 %v837_v21, 0.0  ;;  %v870_v6 = vmax.f32 %v838_v41, 0.0 }
 0x3b3   :  { %v2831_v3 = vpack.c.bf16 %v866_v9, %v865_v58  ;;  %v871_v7 = vmax.f32 %v839_v22, 0.0  ;;  %v872_v49 = vmax.f32 %v840_v25, 0.0  ;;  %v873_v10 = vmax.f32 %v841_v28, 0.0 }
 0x3b4   :  { %v2833_v12 = vpack.c.bf16 %v868_v11, %v867_v0  ;;  %v2835_v14 = vpack.c.bf16 %v870_v6, %v869_v4  ;;  %v874_v16 = vmax.f32 %v842_v32, 0.0  ;;  %v875_v33 = vmax.f32 %v843_v35, 0.0 }
 0x3b5   :  { %v2837_v26 = vpack.c.bf16 %v872_v49, %v871_v7  ;;  %v876_v61 = vmax.f32 %v844_v37, 0.0  ;;  %v849_v62 = vmax.f32 %v817_v48, 0.0  ;;  %v850_v55 = vmax.f32 %v818_v8, 0.0 }
 0x3b6   :  { %v2839_v53 = vpack.c.bf16 %v874_v16, %v873_v10  ;;  %v783_v63 = vmul.f32 %v2754_v46, %v2562_v13  ;;  %v784_v27 = vmul.f32 %v2754_v46, %v2566_v15  ;;  %v785_v41 = vmul.f32 %v2754_v46, %v2572_v29 }
 0x3b7   :  { %v2842_v47 = vpack.c.bf16 %v876_v61, %v875_v33  ;;  %v879_v17 = vpack.c.bf16 %v850_v55, %v849_v62  ;;  %v786_v22 = vmul.f32 %v2754_v46, %v2585_v23  ;;  %v787_v35 = vmul.f32 %v2754_v46, %v2595_v36 }
 0x3b8   :  { %v819_v24 = vadd.f32 %v2774_v18, %v783_v63  ;;  %v820_v52 = vadd.f32 %v2774_v18, %v784_v27  ;;  %v821_v13 = vadd.f32 %v2774_v18, %v785_v41  ;;  %v788_v37 = vmul.f32 %v2754_v46, %v2605_v45 }
 0x3b9   :  { %1032 = vmatmul.mubr.bf16.gmra.mxu1 %v878_v1  ;;  %v822_v15 = vadd.f32 %v2774_v18, %v786_v22  ;;  %v823_v29 = vadd.f32 %v2774_v18, %v787_v35  ;;  %v789_v43 = vmul.f32 %v2754_v46, %v2615_v57  ;;  %v790_v44 = vmul.f32 %v2754_v46, %v2625_v59 }
 0x3ba   :  { %1041 = vmatprep.mubr.bf16.mxu1 %v2222_v2  ;;  %v851_v19 = vmax.f32 %v819_v24, 0.0  ;;  %v852_v21 = vmax.f32 %v820_v52, 0.0  ;;  %v853_v28 = vmax.f32 %v821_v13, 0.0  ;;  %v824_v23 = vadd.f32 %v2774_v18, %v788_v37 }
 0x3bb   :  { %v854_v32 = vmax.f32 %v822_v15, 0.0  ;;  %v855_v39 = vmax.f32 %v823_v29, 0.0  ;;  %v825_v36 = vadd.f32 %v2774_v18, %v789_v43  ;;  %v826_v45 = vadd.f32 %v2774_v18, %v790_v44 }
 0x3bc   :  { %v880_v25 = vpack.c.bf16 %v852_v21, %v851_v19  ;;  %v856_v40 = vmax.f32 %v824_v23, 0.0  ;;  %v791_v50 = vmul.f32 %v2754_v46, %v2635_v20  ;;  %v792_v51 = vmul.f32 %v2754_v46, %v2643_v31 }
 0x3bd   :  { %v881_v38 = vpack.c.bf16 %v854_v32, %v853_v28  ;;  %v857_v42 = vmax.f32 %v825_v36, 0.0  ;;  %v858_v48 = vmax.f32 %v826_v45, 0.0 }
 0x3be   :  { %v882_v30 = vpack.c.bf16 %v856_v40, %v855_v39  ;;  %v827_v57 = vadd.f32 %v2774_v18, %v791_v50  ;;  %v828_v59 = vadd.f32 %v2774_v18, %v792_v51 }
 0x3bf   :  { %v883_v8 = vpack.c.bf16 %v858_v48, %v857_v42 }
 0x3c0   :  { %v859_v54 = vmax.f32 %v827_v57, 0.0  ;;  %v860_v56 = vmax.f32 %v828_v59, 0.0 }
 0x3c1   :  { %1042 = vmatmul.mubr.bf16.gmra.mxu1 %v879_v17 }
 0x3c2   :  { %1051 = vmatprep.mubr.bf16.mxu1 %v2222_v2  ;;  %v884_v58 = vpack.c.bf16 %v860_v56, %v859_v54 }
 0x3c9   :  { %1052 = vmatmul.mubr.bf16.gmra.mxu1 %v880_v25 }
 0x3ca   :  { %1061 = vmatprep.mubr.bf16.mxu1 %v2222_v2 }
 0x3d1   :  { %1062 = vmatmul.mubr.bf16.gmra.mxu1 %v881_v38 }
 0x3d2   :  { %1071 = vmatprep.mubr.bf16.mxu1 %v2222_v2 }
 0x3d9   :  { %1072 = vmatmul.mubr.bf16.gmra.mxu1 %v882_v30 }
 0x3da   :  { %1081 = vmatprep.mubr.bf16.mxu1 %v2222_v2 }
 0x3e1   :  { %1082 = vmatmul.mubr.bf16.gmra.mxu1 %v883_v8 }
 0x3e2   :  { %1091 = vmatprep.mubr.bf16.mxu1 %v2222_v2 }
 0x3e9   :  { %1092 = vmatmul.mubr.bf16.gmra.mxu1 %v884_v58 }
 0x3ea   :  { %1101 = vmatprep.mubr.bf16.mxu1 %v2222_v2 }
 0x3f1   :  { %1102 = vmatmul.mubr.bf16.gmra.mxu1 %v2827_v34 }
 0x3f2   :  { %1111 = vmatprep.mubr.bf16.mxu1 %v2222_v2 }
 0x3f9   :  { %1112 = vmatmul.mubr.bf16.gmra.mxu1 %v2829_v5 }
 0x3fa   :  { %1121 = vmatprep.mubr.bf16.mxu1 %v2222_v2 }
 0x401   :  { %1122 = vmatmul.mubr.bf16.gmra.mxu1 %v2831_v3 }
 0x402   :  { %1131 = vmatprep.mubr.bf16.mxu1 %v2222_v2 }
 0x409   :  { %1132 = vmatmul.mubr.bf16.gmra.mxu1 %v2833_v12 }
 0x40a   :  { %1141 = vmatprep.mubr.bf16.mxu1 %v2222_v2 }
 0x411   :  { %1142 = vmatmul.mubr.bf16.gmra.mxu1 %v2835_v14 }
 0x412   :  { %1151 = vmatprep.mubr.bf16.mxu1 %v2222_v2 }
 0x419   :  { %1152 = vmatmul.mubr.bf16.gmra.mxu1 %v2837_v26 }
 0x41a   :  { %1161 = vmatprep.mubr.bf16.mxu1 %v2222_v2 }
 0x421   :  { %1162 = vmatmul.mubr.bf16.gmra.mxu1 %v2839_v53 }
 0x422   :  { %1171 = vmatprep.mubr.bf16.mxu1 %v2222_v2 }
 0x429   :  { %1172 = vmatmul.mubr.bf16.gmra.mxu1 %v2842_v47 }
 0x471   :  { %v2895_v20 = vpop.f32.mrf.mxu1 }
 0x472   :  { %3737 = vst [vmem:[#allocation18_spill] sm:$0xff] %v2895_v20  ;;  %v1258_v22 = vmul.f32 %v2895_v20, %v2895_v20 }
 0x473   :  { %v2897_v31 = vpop.f32.mrf.mxu1 }
 0x474   :  { %3738 = vst [vmem:[#allocation19_spill] sm:$0xff] %v2897_v31  ;;  %v1259_v25 = vmul.f32 %v2897_v31, %v2897_v31 }
 0x475   :  { %v2899_v46 = vpop.f32.mrf.mxu1 }
 0x476   :  { %3739 = vst [vmem:[#allocation20_spill] sm:$0xff] %v2899_v46  ;;  %v1260_v19 = vmul.f32 %v2899_v46, %v2899_v46  ;;  %v1184_v13 = vadd.f32 %v2899_v46, %v2895_v20 }
 0x477   :  { %v2901_v18 = vpop.f32.mrf.mxu1 }
 0x478   :  { %3740 = vst [vmem:[#allocation21_spill] sm:$0xff] %v2901_v18  ;;  %v1261_v21 = vmul.f32 %v2901_v18, %v2901_v18  ;;  %v1322_v35 = vadd.f32 %v1260_v19, %v1258_v22  ;;  %v1221_v37 = vadd.f32 %v2901_v18, %v2897_v31 }
 0x479   :  { %v2903_v1 = vpop.f32.mrf.mxu1 }
 0x47a   :  { %3741 = vst [vmem:[#allocation22_spill] sm:$0xff] %v2903_v1  ;;  %v1262_v15 = vmul.f32 %v2903_v1, %v2903_v1  ;;  %v1185_v29 = vadd.f32 %v1184_v13, %v2903_v1  ;;  %v1359_v38 = vadd.f32 %v1261_v21, %v1259_v25 }
 0x47b   :  { %v2905_v34 = vpop.f32.mrf.mxu1 }
 0x47c   :  { %3742 = vst [vmem:[#allocation23_spill] sm:$0xff] %v2905_v34  ;;  %v1263_v28 = vmul.f32 %v2905_v34, %v2905_v34  ;;  %v1323_v43 = vadd.f32 %v1322_v35, %v1262_v15  ;;  %v1222_v44 = vadd.f32 %v1221_v37, %v2905_v34 }
 0x47d   :  { %v2907_v9 = vpop.f32.mrf.mxu1 }
 0x47e   :  { %3743 = vst [vmem:[#allocation24_spill] sm:$0xff] %v2907_v9  ;;  %v1264_v23 = vmul.f32 %v2907_v9, %v2907_v9  ;;  %v1186_v36 = vadd.f32 %v1185_v29, %v2907_v9  ;;  %v1360_v30 = vadd.f32 %v1359_v38, %v1263_v28 }
 0x47f   :  { %v2909_v0 = vpop.f32.mrf.mxu1 }
 0x480   :  { %3744 = vst [vmem:[#allocation25_spill] sm:$0xff] %v2909_v0  ;;  %v1265_v39 = vmul.f32 %v2909_v0, %v2909_v0  ;;  %v1324_v50 = vadd.f32 %v1323_v43, %v1264_v23  ;;  %v1223_v51 = vadd.f32 %v1222_v44, %v2909_v0 }
 0x481   :  { %v2911_v5 = vpop.f32.mrf.mxu1 }
 0x482   :  { %3745 = vst [vmem:[#allocation26_spill] sm:$0xff] %v2911_v5  ;;  %v1266_v45 = vmul.f32 %v2911_v5, %v2911_v5  ;;  %v1187_v57 = vadd.f32 %v1186_v36, %v2911_v5  ;;  %v1361_v8 = vadd.f32 %v1360_v30, %v1265_v39 }
 0x483   :  { %v2913_v2 = vpop.f32.mrf.mxu1 }
 0x484   :  { %3746 = vst [vmem:[#allocation27_spill] sm:$0xff] %v2913_v2  ;;  %v1267_v42 = vmul.f32 %v2913_v2, %v2913_v2  ;;  %v1325_v58 = vadd.f32 %v1324_v50, %v1266_v45  ;;  %v1224_v19 = vadd.f32 %v1223_v51, %v2913_v2 }
 0x485   :  { %v2915_v11 = vpop.f32.mrf.mxu1 }
 0x486   :  { %3747 = vst [vmem:[#allocation28_spill] sm:$0xff] %v2915_v11  ;;  %v1268_v59 = vmul.f32 %v2915_v11, %v2915_v11  ;;  %v1188_v21 = vadd.f32 %v1187_v57, %v2915_v11  ;;  %v1362_v13 = vadd.f32 %v1361_v8, %v1267_v42 }
 0x487   :  { %v2917_v4 = vpop.f32.mrf.mxu1 }
 0x488   :  { %3748 = vst [vmem:[#allocation29_spill] sm:$0xff] %v2917_v4  ;;  %v1269_v54 = vmul.f32 %v2917_v4, %v2917_v4  ;;  %v1326_v28 = vadd.f32 %v1325_v58, %v1268_v59  ;;  %v1225_v35 = vadd.f32 %v1224_v19, %v2917_v4 }
 0x489   :  { %v2919_v6 = vpop.f32.mrf.mxu1 }
 0x48a   :  { %3749 = vst [vmem:[#allocation30_spill] sm:$0xff] %v2919_v6  ;;  %v1270_v22 = vmul.f32 %v2919_v6, %v2919_v6  ;;  %v1189_v37 = vadd.f32 %v1188_v21, %v2919_v6  ;;  %v1363_v23 = vadd.f32 %v1362_v13, %v1269_v54 }
 0x48b   :  { %v2921_v3 = vpop.f32.mrf.mxu1 }
 0x48c   :  { %3750 = vst [vmem:[#allocation31_spill] sm:$0xff] %v2921_v3  ;;  %v1271_v15 = vmul.f32 %v2921_v3, %v2921_v3  ;;  %v1327_v43 = vadd.f32 %v1326_v28, %v1270_v22  ;;  %v1226_v44 = vadd.f32 %v1225_v35, %v2921_v3 }
 0x48d   :  { %v2923_v7 = vpop.f32.mrf.mxu1 }
 0x48e   :  { %3751 = vst [vmem:[#allocation32_spill] sm:$0xff] %v2923_v7  ;;  %v1272_v29 = vmul.f32 %v2923_v7, %v2923_v7  ;;  %v1190_v36 = vadd.f32 %v1189_v37, %v2923_v7  ;;  %v1364_v30 = vadd.f32 %v1363_v23, %v1271_v15 }
 0x48f   :  { %v2925_v49 = vpop.f32.mrf.mxu1 }
 0x490   :  { %3752 = vst [vmem:[#allocation33_spill] sm:$0xff] %v2925_v49  ;;  %v1273_v38 = vmul.f32 %v2925_v49, %v2925_v49  ;;  %v1328_v51 = vadd.f32 %v1327_v43, %v1272_v29  ;;  %v1227_v57 = vadd.f32 %v1226_v44, %v2925_v49 }
 0x491   :  { %v2927_v10 = vpop.f32.mrf.mxu1 }
 0x492   :  { %3753 = vst [vmem:[#allocation34_spill] sm:$0xff] %v2927_v10  ;;  %v1274_v45 = vmul.f32 %v2927_v10, %v2927_v10  ;;  %v1191_v59 = vadd.f32 %v1190_v36, %v2927_v10  ;;  %v1365_v54 = vadd.f32 %v1364_v30, %v1273_v38 }
 0x493   :  { %v2929_v12 = vpop.f32.mrf.mxu1 }
 0x494   :  { %3754 = vst [vmem:[#allocation35_spill] sm:$0xff] %v2929_v12  ;;  %v1275_v42 = vmul.f32 %v2929_v12, %v2929_v12  ;;  %v1329_v21 = vadd.f32 %v1328_v51, %v1274_v45  ;;  %v1228_v22 = vadd.f32 %v1227_v57, %v2929_v12 }
 0x495   :  { %v2931_v14 = vpop.f32.mrf.mxu1 }
 0x496   :  { %3755 = vst [vmem:[#allocation36_spill] sm:$0xff] %v2931_v14  ;;  %v1276_v8 = vmul.f32 %v2931_v14, %v2931_v14  ;;  %v1192_v13 = vadd.f32 %v1191_v59, %v2931_v14  ;;  %v1366_v28 = vadd.f32 %v1365_v54, %v1275_v42 }
 0x497   :  { %v2933_v16 = vpop.f32.mrf.mxu1 }
 0x498   :  { %3756 = vst [vmem:[#allocation37_spill] sm:$0xff] %v2933_v16  ;;  %v1277_v58 = vmul.f32 %v2933_v16, %v2933_v16  ;;  %v1330_v29 = vadd.f32 %v1329_v21, %v1276_v8  ;;  %v1229_v23 = vadd.f32 %v1228_v22, %v2933_v16 }
 0x499   :  { %v2935_v33 = vpop.f32.mrf.mxu1 }
 0x49a   :  { %v1278_v15 = vmul.f32 %v2935_v33, %v2935_v33  ;;  %v1193_v38 = vadd.f32 %v1192_v13, %v2935_v33  ;;  %v1367_v44 = vadd.f32 %v1366_v28, %v1277_v58 }
 0x49b   :  { %v2937_v26 = vpop.f32.mrf.mxu1 }
 0x49c   :  { %3757 = vst [vmem:[#allocation38_spill] sm:$0xff] %v2937_v26  ;;  %v1279_v35 = vmul.f32 %v2937_v26, %v2937_v26  ;;  %v1331_v30 = vadd.f32 %v1330_v29, %v1278_v15  ;;  %v1230_v42 = vadd.f32 %v1229_v23, %v2937_v26 }
 0x49d   :  { %v2939_v61 = vpop.f32.mrf.mxu1 }
 0x49e   :  { %v1280_v43 = vmul.f32 %v2939_v61, %v2939_v61  ;;  %v1194_v51 = vadd.f32 %v1193_v38, %v2939_v61  ;;  %v1368_v59 = vadd.f32 %v1367_v44, %v1279_v35 }
 0x49f   :  { %v2941_v53 = vpop.f32.mrf.mxu1 }
 0x4a0   :  { %3758 = vst [vmem:[#allocation39_spill] sm:$0xff] %v2941_v53  ;;  %v1281_v36 = vmul.f32 %v2941_v53, %v2941_v53  ;;  %v1332_v58 = vadd.f32 %v1331_v30, %v1280_v43  ;;  %v1231_v21 = vadd.f32 %v1230_v42, %v2941_v53 }
 0x4a1   :  { %v2943_v47 = vpop.f32.mrf.mxu1 }
 0x4a2   :  { %3759 = vst [vmem:[#allocation40_spill] sm:$0xff] %v2943_v47  ;;  %v1282_v57 = vmul.f32 %v2943_v47, %v2943_v47  ;;  %v1195_v22 = vadd.f32 %v1194_v51, %v2943_v47  ;;  %v1369_v15 = vadd.f32 %v1368_v59, %v1281_v36 }
 0x4a3   :  { %v2945_v62 = vpop.f32.mrf.mxu1 }
 0x4a4   :  { %3760 = vst [vmem:[#allocation41_spill] sm:$0xff] %v2945_v62  ;;  %v1283_v8 = vmul.f32 %v2945_v62, %v2945_v62  ;;  %v1333_v35 = vadd.f32 %v1332_v58, %v1282_v57  ;;  %v1232_v23 = vadd.f32 %v1231_v21, %v2945_v62 }
 0x4a5   :  { %v2947_v55 = vpop.f32.mrf.mxu1 }
 0x4a6   :  { %3761 = vst [vmem:[#allocation42_spill] sm:$0xff] %v2947_v55  ;;  %v1284_v13 = vmul.f32 %v2947_v55, %v2947_v55  ;;  %v1196_v38 = vadd.f32 %v1195_v22, %v2947_v55  ;;  %v1370_v44 = vadd.f32 %v1369_v15, %v1283_v8 }
 0x4a7   :  { %v2949_v63 = vpop.f32.mrf.mxu1 }
 0x4a8   :  { %3762 = vst [vmem:[#allocation43_spill] sm:$0xff] %v2949_v63  ;;  %v1285_v28 = vmul.f32 %v2949_v63, %v2949_v63  ;;  %v1334_v36 = vadd.f32 %v1333_v35, %v1284_v13  ;;  %v1233_v51 = vadd.f32 %v1232_v23, %v2949_v63 }
 0x4a9   :  { %v2951_v27 = vpop.f32.mrf.mxu1 }
 0x4aa   :  { %v1286_v43 = vmul.f32 %v2951_v27, %v2951_v27  ;;  %v1197_v59 = vadd.f32 %v1196_v38, %v2951_v27  ;;  %v1371_v58 = vadd.f32 %v1370_v44, %v1285_v28 }
 0x4ab   :  { %v2953_v24 = vpop.f32.mrf.mxu1 }
 0x4ac   :  { %v1287_v30 = vmul.f32 %v2953_v24, %v2953_v24  ;;  %v1335_v8 = vadd.f32 %v1334_v36, %v1286_v43  ;;  %v1234_v15 = vadd.f32 %v1233_v51, %v2953_v24 }
 0x4ad   :  { %v2955_v52 = vpop.f32.mrf.mxu1 }
 0x4ae   :  { %v1288_v57 = vmul.f32 %v2955_v52, %v2955_v52  ;;  %v1198_v46 = vadd.f32 %v1197_v59, %v2955_v52  ;;  %v1372_v35 = vadd.f32 %v1371_v58, %v1287_v30 }
 0x4af   :  { %v2957_v17 = vpop.f32.mrf.mxu1 }
 0x4b0   :  { %v1289_v21 = vmul.f32 %v2957_v17, %v2957_v17  ;;  %v1336_v28 = vadd.f32 %v1335_v8, %v1288_v57  ;;  %v1235_v44 = vadd.f32 %v1234_v15, %v2957_v17 }
 0x4b1   :  { %v2963_v41 = vpop.f32.mrf.mxu1 }
 0x4b2   :  { %v1290_v13 = vmul.f32 %v2963_v41, %v2963_v41  ;;  %v1199_v20 = vadd.f32 %v1198_v46, %v2963_v41  ;;  %v1373_v36 = vadd.f32 %v1372_v35, %v1289_v21 }
 0x4b3   :  { %v2975_v32 = vpop.f32.mrf.mxu1 }
 0x4b4   :  { %v1291_v23 = vmul.f32 %v2975_v32, %v2975_v32  ;;  %v1337_v30 = vadd.f32 %v1336_v28, %v1290_v13  ;;  %v1236_v58 = vadd.f32 %v1235_v44, %v2975_v32 }
 0x4b5   :  { %v2984_v40 = vpop.f32.mrf.mxu1 }
 0x4b6   :  { %v1292_v43 = vmul.f32 %v2984_v40, %v2984_v40  ;;  %v1200_v18 = vadd.f32 %v1199_v20, %v2984_v40  ;;  %v1374_v8 = vadd.f32 %v1373_v36, %v1291_v23 }
 0x4b7   :  { %v2992_v48 = vpop.f32.mrf.mxu1 }
 0x4b8   :  { %v1293_v51 = vmul.f32 %v2992_v48, %v2992_v48  ;;  %v1338_v21 = vadd.f32 %v1337_v30, %v1292_v43  ;;  %v1237_v35 = vadd.f32 %v1236_v58, %v2992_v48 }
 0x4b9   :  { %v3000_v56 = vpop.f32.mrf.mxu1 }
 0x4ba   :  { %v1294_v57 = vmul.f32 %v3000_v56, %v3000_v56  ;;  %v1201_v31 = vadd.f32 %v1200_v18, %v3000_v56  ;;  %v1375_v28 = vadd.f32 %v1374_v8, %v1293_v51 }
 0x4bb   :  { %v3008_v25 = vpop.f32.mrf.mxu1 }
 0x4bc   :  { %v1295_v46 = vmul.f32 %v3008_v25, %v3008_v25  ;;  %v1339_v23 = vadd.f32 %v1338_v21, %v1294_v57  ;;  %v1238_v36 = vadd.f32 %v1237_v35, %v3008_v25 }
 0x4bd   :  { %v3016_v39 = vpop.f32.mrf.mxu1 }
 0x4be   :  { %v1296_v13 = vmul.f32 %v3016_v39, %v3016_v39  ;;  %v1202_v9 = vadd.f32 %v1201_v31, %v3016_v39  ;;  %v1376_v30 = vadd.f32 %v1375_v28, %v1295_v46 }
 0x4bf   :  { %v3024_v50 = vpop.f32.mrf.mxu1 }
 0x4c0   :  { %v1297_v20 = vmul.f32 %v3024_v50, %v3024_v50  ;;  %v1340_v51 = vadd.f32 %v1339_v23, %v1296_v13  ;;  %v1239_v8 = vadd.f32 %v1238_v36, %v3024_v50 }
 0x4c1   :  { %v3032_v19 = vpop.f32.mrf.mxu1 }
 0x4c2   :  { %v1298_v43 = vmul.f32 %v3032_v19, %v3032_v19  ;;  %v1203_v1 = vadd.f32 %v1202_v9, %v3032_v19  ;;  %v1377_v21 = vadd.f32 %v1376_v30, %v1297_v20 }
 0x4c3   :  { %v3040_v37 = vpop.f32.mrf.mxu1 }
 0x4c4   :  { %v1299_v18 = vmul.f32 %v3040_v37, %v3040_v37  ;;  %v1341_v46 = vadd.f32 %v1340_v51, %v1298_v43  ;;  %v1240_v28 = vadd.f32 %v1239_v8, %v3040_v37 }
 0x4c5   :  { %v3048_v45 = vpop.f32.mrf.mxu1 }
 0x4c6   :  { %v1300_v57 = vmul.f32 %v3048_v45, %v3048_v45  ;;  %v1204_v0 = vadd.f32 %v1203_v1, %v3048_v45  ;;  %v1378_v23 = vadd.f32 %v1377_v21, %v1299_v18 }
 0x4c7   :  { %v3056_v54 = vpop.f32.mrf.mxu1 }
 0x4c8   :  { %v1301_v31 = vmul.f32 %v3056_v54, %v3056_v54  ;;  %v1342_v20 = vadd.f32 %v1341_v46, %v1300_v57  ;;  %v1241_v30 = vadd.f32 %v1240_v28, %v3056_v54 }
 0x4c9   :  { %v3064_v29 = vpop.f32.mrf.mxu1 }
 0x4ca   :  { %v1302_v13 = vmul.f32 %v3064_v29, %v3064_v29  ;;  %v1205_v34 = vadd.f32 %v1204_v0, %v3064_v29  ;;  %v1379_v51 = vadd.f32 %v1378_v23, %v1301_v31 }
 0x4cb   :  { %v3072_v42 = vpop.f32.mrf.mxu1 }
 0x4cc   :  { %v1303_v9 = vmul.f32 %v3072_v42, %v3072_v42  ;;  %v1343_v18 = vadd.f32 %v1342_v20, %v1302_v13  ;;  %v1242_v21 = vadd.f32 %v1241_v30, %v3072_v42 }
 0x4cd   :  { %v3080_v22 = vpop.f32.mrf.mxu1 }
 0x4ce   :  { %v1304_v43 = vmul.f32 %v3080_v22, %v3080_v22  ;;  %v1206_v11 = vadd.f32 %v1205_v34, %v3080_v22  ;;  %v1380_v46 = vadd.f32 %v1379_v51, %v1303_v9 }
 0x4cf   :  { %v3088_v38 = vpop.f32.mrf.mxu1 }
 0x4d0   :  { %v1305_v1 = vmul.f32 %v3088_v38, %v3088_v38  ;;  %v1344_v31 = vadd.f32 %v1343_v18, %v1304_v43  ;;  %v1243_v23 = vadd.f32 %v1242_v21, %v3088_v38 }
 0x4d1   :  { %v3096_v59 = vpop.f32.mrf.mxu1 }
 0x4d2   :  { %v1306_v57 = vmul.f32 %v3096_v59, %v3096_v59  ;;  %v1207_v5 = vadd.f32 %v1206_v11, %v3096_v59  ;;  %v1381_v20 = vadd.f32 %v1380_v46, %v1305_v1 }
 0x4d3   :  { %v3104_v15 = vpop.f32.mrf.mxu1 }
 0x4d4   :  { %v1307_v0 = vmul.f32 %v3104_v15, %v3104_v15  ;;  %v1345_v9 = vadd.f32 %v1344_v31, %v1306_v57  ;;  %v1244_v51 = vadd.f32 %v1243_v23, %v3104_v15 }
 0x4d5   :  { %v3112_v44 = vpop.f32.mrf.mxu1 }
 0x4d6   :  { %v1308_v13 = vmul.f32 %v3112_v44, %v3112_v44  ;;  %v1208_v4 = vadd.f32 %v1207_v5, %v3112_v44  ;;  %v1382_v18 = vadd.f32 %v1381_v20, %v1307_v0 }
 0x4d7   :  { %v3120_v58 = vpop.f32.mrf.mxu1 }
 0x4d8   :  { %v1309_v34 = vmul.f32 %v3120_v58, %v3120_v58  ;;  %v1346_v1 = vadd.f32 %v1345_v9, %v1308_v13  ;;  %v1245_v46 = vadd.f32 %v1244_v51, %v3120_v58 }
 0x4d9   :  { %v3128_v35 = vpop.f32.mrf.mxu1 }
 0x4da   :  { %v1310_v43 = vmul.f32 %v3128_v35, %v3128_v35  ;;  %v1209_v2 = vadd.f32 %v1208_v4, %v3128_v35  ;;  %v1383_v31 = vadd.f32 %v1382_v18, %v1309_v34 }
 0x4db   :  { %v3136_v36 = vpop.f32.mrf.mxu1 }
 0x4dc   :  { %v1311_v11 = vmul.f32 %v3136_v36, %v3136_v36  ;;  %v1347_v0 = vadd.f32 %v1346_v1, %v1310_v43  ;;  %v1246_v20 = vadd.f32 %v1245_v46, %v3136_v36 }
 0x4dd   :  { %v3144_v8 = vpop.f32.mrf.mxu1 }
 0x4de   :  { %v1312_v57 = vmul.f32 %v3144_v8, %v3144_v8  ;;  %v1210_v7 = vadd.f32 %v1209_v2, %v3144_v8  ;;  %v1384_v9 = vadd.f32 %v1383_v31, %v1311_v11 }
 0x4df   :  { %v3152_v28 = vpop.f32.mrf.mxu1 }
 0x4e0   :  { %v1313_v5 = vmul.f32 %v3152_v28, %v3152_v28  ;;  %v1348_v34 = vadd.f32 %v1347_v0, %v1312_v57  ;;  %v1247_v18 = vadd.f32 %v1246_v20, %v3152_v28 }
 0x4e1   :  { %v3160_v30 = vpop.f32.mrf.mxu1 }
 0x4e2   :  { %v1314_v13 = vmul.f32 %v3160_v30, %v3160_v30  ;;  %v1211_v6 = vadd.f32 %v1210_v7, %v3160_v30  ;;  %v1385_v1 = vadd.f32 %v1384_v9, %v1313_v5 }
 0x4e3   :  { %v3168_v21 = vpop.f32.mrf.mxu1 }
 0x4e4   :  { %v1315_v4 = vmul.f32 %v3168_v21, %v3168_v21  ;;  %v1349_v11 = vadd.f32 %v1348_v34, %v1314_v13  ;;  %v1248_v31 = vadd.f32 %v1247_v18, %v3168_v21 }
 0x4e5   :  { %v3176_v23 = vpop.f32.mrf.mxu1 }
 0x4e6   :  { %v1316_v43 = vmul.f32 %v3176_v23, %v3176_v23  ;;  %v1212_v49 = vadd.f32 %v1211_v6, %v3176_v23  ;;  %v1386_v0 = vadd.f32 %v1385_v1, %v1315_v4 }
 0x4e7   :  { %v3184_v51 = vpop.f32.mrf.mxu1 }
 0x4e8   :  { %v1317_v2 = vmul.f32 %v3184_v51, %v3184_v51  ;;  %v1350_v7 = vadd.f32 %v1349_v11, %v1316_v43  ;;  %v1249_v3 = vadd.f32 %v1248_v31, %v3184_v51 }
 0x4e9   :  { %v3192_v46 = vpop.f32.mrf.mxu1 }
 0x4ea   :  { %v1318_v57 = vmul.f32 %v3192_v46, %v3192_v46  ;;  %v1213_v5 = vadd.f32 %v1212_v49, %v3192_v46  ;;  %v1387_v14 = vadd.f32 %v1386_v0, %v1317_v2 }
 0x4eb   :  { %v3198_v20 = vpop.f32.mrf.mxu1 }
 0x4ec   :  { %3763 = vst [vmem:[#allocation44_spill] sm:$0xff] %v3198_v20  ;;  %v1319_v9 = vmul.f32 %v3198_v20, %v3198_v20  ;;  %v1351_v34 = vadd.f32 %v1350_v7, %v1318_v57  ;;  %v1250_v6 = vadd.f32 %v1249_v3, %v3198_v20 }
 0x4ed   :  { %v3204_v13 = vpop.f32.mrf.mxu1 }
 0x4ee   :  { %v1214_v18 = vadd.f32 %v1213_v5, %v3204_v13  ;;  %v1320_v4 = vmul.f32 %v3204_v13, %v3204_v13  ;;  %v1388_v1 = vadd.f32 %v1387_v14, %v1319_v9 }
 0x4ef   :  { %v3210_v43 = vpop.f32.mrf.mxu1 }
 0x4f0   :  { %3764 = vst [vmem:[#allocation45_spill] sm:$0xff] %v3210_v43  ;;  %v1215_v11 = vrot.slane %v1214_v18, 4  ;;  %v1352_v31 = vadd.f32 %v1351_v34, %v1320_v4  ;;  %v1251_v49 = vadd.f32 %v1250_v6, %v3210_v43  ;;  %v1321_v2 = vmul.f32 %v3210_v43, %v3210_v43 }
 0x4f2   :  { %v1216_v0 = vadd.f32 %v1215_v11, %v1214_v18  ;;  %v1353_v10 = vrot.slane %v1352_v31, 4  ;;  %v1252_v57 = vrot.slane %v1251_v49, 4  ;;  %v1389_v7 = vadd.f32 %v1388_v1, %v1321_v2 }
 0x4f4   :  { %v1217_v3 = vrot.slane %v1216_v0, 2  ;;  %v1354_v20 = vadd.f32 %v1353_v10, %v1352_v31  ;;  %v1390_v5 = vrot.slane %v1389_v7, 4  ;;  %v1253_v16 = vadd.f32 %v1252_v57, %v1251_v49 }
 0x4f6   :  { %v1218_v53 = vadd.f32 %v1217_v3, %v1216_v0  ;;  %v1355_v26 = vrot.slane %v1354_v20, 2  ;;  %v1391_v14 = vadd.f32 %v1390_v5, %v1389_v7  ;;  %v1254_v63 = vrot.slane %v1253_v16, 2 }
 0x4f8   :  { %v1219_v9 = vrot.slane %v1218_v53, 1  ;;  %v1356_v12 = vadd.f32 %v1355_v26, %v1354_v20  ;;  %v1392_v6 = vrot.slane %v1391_v14, 2  ;;  %v1255_v11 = vadd.f32 %v1254_v63, %v1253_v16 }
 0x4fa   :  { %v1220_v34 = vadd.f32 %v1219_v9, %v1218_v53  ;;  %v1357_v4 = vrot.slane %v1356_v12, 1  ;;  %v1393_v10 = vadd.f32 %v1392_v6, %v1391_v14  ;;  %v1256_v1 = vrot.slane %v1255_v11, 1 }
 0x4fc   :  { %1397 = vrot.lane.b32.xlu0 %v1220_v34, %s2224_s3  ;;  %v1358_v18 = vadd.f32 %v1357_v4, %v1356_v12  ;;  %v1394_v26 = vrot.slane %v1393_v10, 1  ;;  %v1257_v53 = vadd.f32 %v1256_v1, %v1255_v11 }
 0x4fe   :  { %1402 = vrot.lane.b32.xlu1 %v1358_v18, %s2224_s3  ;;  %v1395_v20 = vadd.f32 %v1394_v26, %v1393_v10 }
 0x500   :  { %1406 = vrot.lane.b32.xlu0 %v1220_v34, %s2223_s2 }
 0x502   :  { %1410 = vrot.lane.b32.xlu1 %v1358_v18, %s2223_s2 }
 0x504   :  { %1414 = vrot.lane.b32.xlu0 %v1220_v34, %s2225_s19 }
 0x506   :  { %1418 = vrot.lane.b32.xlu1 %v1358_v18, %s2225_s19 }
 0x508   :  { %1425 = vrot.lane.b32.xlu0 %v1257_v53, %s2224_s3 }
 0x50a   :  { %1430 = vrot.lane.b32.xlu1 %v1395_v20, %s2224_s3 }
 0x50c   :  { %1434 = vrot.lane.b32.xlu0 %v1257_v53, %s2223_s2 }
 0x50e   :  { %1438 = vrot.lane.b32.xlu1 %v1395_v20, %s2223_s2 }
 0x510   :  { %1442 = vrot.lane.b32.xlu0 %v1257_v53, %s2225_s19 }
 0x512   :  { %1446 = vrot.lane.b32.xlu1 %v1395_v20, %s2225_s19 }
 0x56e   :  { %v1398_v12 = vpop.permute.xlu0 %1397 }
 0x56f   :  { %v1400_v31 = vadd.f32 %v1398_v12, %v1220_v34 }
 0x570   :  { %v1403_v16 = vpop.permute.xlu1 %1402 }
 0x571   :  { %v1405_v2 = vadd.f32 %v1403_v16, %v1358_v18 }
 0x572   :  { %v1407_v63 = vpop.permute.xlu0 %1406 }
 0x573   :  { %v1409_v0 = vadd.f32 %v1407_v63, %v1400_v31 }
 0x574   :  { %v1411_v49 = vpop.permute.xlu1 %1410 }
 0x575   :  { %v1413_v7 = vadd.f32 %v1411_v49, %v1405_v2 }
 0x576   :  { %v1415_v57 = vpop.permute.xlu0 %1414 }
 0x577   :  { %v1417_v3 = vadd.f32 %v1415_v57, %v1409_v0 }
 0x578   :  { %v1419_v5 = vpop.permute.xlu1 %1418 }
 0x579   :  { %v1421_v14 = vadd.f32 %v1419_v5, %v1413_v7  ;;  %v1422_v4 = vadd.f32 %v1417_v3, %v1257_v53  ;;  %v1182_v53 = vld [vmem:[#allocation11] sm:$0x1]  ;;  %v1183_v7 = vld [vmem:[#allocation12] sm:$0x1] }
 0x57a   :  { %v1426_v9 = vpop.permute.xlu0 %1425 }
 0x57b   :  { %v1423_v11 = vadd.f32 %v1421_v14, %v1395_v20  ;;  %v1428_v1 = vadd.f32 %v1426_v9, %v1422_v4 }
 0x57c   :  { %v1431_v6 = vpop.permute.xlu1 %1430 }
 0x57d   :  { %v1433_v43 = vadd.f32 %v1431_v6, %v1423_v11 }
 0x57e   :  { %v1435_v10 = vpop.permute.xlu0 %1434 }
 0x57f   :  { %v1437_v55 = vadd.f32 %v1435_v10, %v1428_v1 }
 0x580   :  { %v1439_v26 = vpop.permute.xlu1 %1438 }
 0x581   :  { %v1441_v47 = vadd.f32 %v1439_v26, %v1433_v43 }
 0x582   :  { %v1443_v62 = vpop.permute.xlu0 %1442 }
 0x583   :  { %v1445_v34 = vadd.f32 %v1443_v62, %v1437_v55 }
 0x584   :  { %v1447_v12 = vpop.permute.xlu1 %1446 }
 0x585   :  { %v1450_v18 = vmul.f32 0.00048828125, %v1445_v34  ;;  %v1449_v16 = vadd.f32 %v1447_v12, %v1441_v47 }
 0x587   :  { %v1452_v63 = vmul.f32 %v1450_v18, %v1450_v18  ;;  %v1451_v31 = vmul.f32 0.00048828125, %v1449_v16 }
 0x589   :  { %v1453_v49 = vsub.f32 %v1451_v31, %v1452_v63 }
 0x58b   :  { %v1454_v2 = vmax.f32 %v1453_v49, 0.0 }
 0x58d   :  { %v1455_v0 = vadd.f32 1e-05, %v1454_v2 }
 0x58f   :  { %2084 = vrsqrt.f32 %v1455_v0 }
 0x59c   :  { %v2085_v57 = vpop.eup %2084 }
 0x59d   :  { %v1457_v20 = vmul.f32 %v2085_v57, %v1182_v53 }
 0x59f   :  { %v1464_v3 = vrot.slane %v1457_v20, %v2475_v60  ;;  %v1458_v5 = vmul.f32 %v1457_v20, %v1450_v18 }
 0x5a1   :  { %1468 = vrot.lane.b32.xlu1 %v1464_v3, %s2223_s2  ;;  %1465 = vrot.lane.b32.xlu0 %v1464_v3, %s2225_s19  ;;  %v1459_v62 = vsub.f32 %v1183_v7, %v1458_v5 }
 0x5a3   :  { %v1483_v47 = vrot.slane %v1459_v62, %v2475_v60 }
 0x5a5   :  { %1471 = vrot.lane.b32.xlu0 %v1464_v3, %s2224_s3  ;;  %1484 = vrot.lane.b32.xlu1 %v1483_v47, %s2225_s19 }
 0x5a9   :  { %1487 = vrot.lane.b32.xlu0 %v1483_v47, %s2223_s2  ;;  %1490 = vrot.lane.b32.xlu1 %v1483_v47, %s2224_s3 }
 0x613   :  { %v1466_v55 = vpop.permute.xlu0 %1465  ;;  %v1469_v43 = vpop.permute.xlu1 %1468 }
 0x614   :  { %v1475_v14 = vsel %vm1474_vm3, %v1457_v20, %v1466_v55 }
 0x615   :  { %v1476_v4 = vsel %vm762_vm2, %v1475_v14, %v1469_v43 }
 0x617   :  { %v1472_v9 = vpop.permute.xlu0 %1471  ;;  %v1485_v11 = vpop.permute.xlu1 %1484 }
 0x618   :  { %v1478_v6 = vsel %vm1477_vm4, %v1476_v4, %v1472_v9  ;;  %v1493_v26 = vsel %vm1474_vm3, %v1459_v62, %v1485_v11 }
 0x619   :  { %v3238_v10 = vrot.slane %v1478_v6, %v2475_v60 }
 0x61b   :  { %v1488_v1 = vpop.permute.xlu0 %1487  ;;  %v1491_v12 = vpop.permute.xlu1 %1490  ;;  %v3243_v18 = vmul.f32 %v3238_v10, %v2951_v27  ;;  %v3247_v16 = vmul.f32 %v3238_v10, %v2953_v24  ;;  %v3251_v63 = vmul.f32 %v3238_v10, %v2955_v52  ;;  %v3255_v31 = vmul.f32 %v3238_v10, %v2957_v17 }
 0x61c   :  { %v1494_v34 = vsel %vm762_vm2, %v1493_v26, %v1488_v1  ;;  %v1532_v49 = vmul.f32 %v3238_v10, %v2963_v41  ;;  %v1533_v2 = vmul.f32 %v3238_v10, %v2975_v32  ;;  %v1534_v27 = vmul.f32 %v3238_v10, %v2984_v40 }
 0x61d   :  { %v1535_v24 = vmul.f32 %v3238_v10, %v2992_v48  ;;  %v1536_v52 = vmul.f32 %v3238_v10, %v3000_v56  ;;  %v1537_v0 = vmul.f32 %v3238_v10, %v3008_v25  ;;  %v1538_v17 = vmul.f32 %v3238_v10, %v3016_v39 }
 0x61e   :  { %v1495_v41 = vsel %vm1477_vm4, %v1494_v34, %v1491_v12  ;;  %v1539_v32 = vmul.f32 %v3238_v10, %v3024_v50  ;;  %v1540_v40 = vmul.f32 %v3238_v10, %v3032_v19  ;;  %v1541_v48 = vmul.f32 %v3238_v10, %v3040_v37 }
 0x61f   :  { %v1542_v56 = vmul.f32 %v3238_v10, %v3048_v45  ;;  %v1543_v25 = vmul.f32 %v3238_v10, %v3056_v54  ;;  %v1544_v39 = vmul.f32 %v3238_v10, %v3064_v29  ;;  %v1545_v53 = vmul.f32 %v3238_v10, %v3072_v42 }
 0x620   :  { %v1546_v50 = vmul.f32 %v3238_v10, %v3080_v22  ;;  %v1547_v19 = vmul.f32 %v3238_v10, %v3088_v38  ;;  %v1548_v37 = vmul.f32 %v3238_v10, %v3096_v59  ;;  %v1549_v45 = vmul.f32 %v3238_v10, %v3104_v15 }
 0x621   :  { %v3295_v54 = vrot.slane %v1495_v41, %v2475_v60  ;;  %v1550_v29 = vmul.f32 %v3238_v10, %v3112_v44  ;;  %v1551_v42 = vmul.f32 %v3238_v10, %v3120_v58  ;;  %v1552_v22 = vmul.f32 %v3238_v10, %v3128_v35 }
 0x622   :  { %v1553_v38 = vmul.f32 %v3238_v10, %v3136_v36  ;;  %v1554_v59 = vmul.f32 %v3238_v10, %v3144_v8  ;;  %v1555_v15 = vmul.f32 %v3238_v10, %v3152_v28  ;;  %v1556_v57 = vmul.f32 %v3238_v10, %v3160_v30 }
 0x623   :  { %v1557_v44 = vmul.f32 %v3238_v10, %v3168_v21  ;;  %v1558_v58 = vmul.f32 %v3238_v10, %v3176_v23  ;;  %v1559_v35 = vmul.f32 %v3238_v10, %v3184_v51  ;;  %v1560_v36 = vmul.f32 %v3238_v10, %v3192_v46 }
 0x624   :  { %v1562_v8 = vmul.f32 %v3238_v10, %v3204_v13  ;;  %v3322_v28 = vadd.f32 %v3295_v54, %v1532_v49  ;;  %v3325_v30 = vadd.f32 %v3295_v54, %v1533_v2  ;;  %v3328_v21 = vadd.f32 %v3295_v54, %v1534_v27 }
 0x625   :  { %v3331_v23 = vadd.f32 %v3295_v54, %v1535_v24  ;;  %v3334_v51 = vadd.f32 %v3295_v54, %v1536_v52  ;;  %v3337_v46 = vadd.f32 %v3295_v54, %v1537_v0  ;;  %v3340_v13 = vadd.f32 %v3295_v54, %v1538_v17 }
 0x626   :  { %v3343_v20 = vadd.f32 %v3295_v54, %v1539_v32  ;;  %v3346_v7 = vadd.f32 %v3295_v54, %v1540_v40  ;;  %v3349_v3 = vadd.f32 %v3295_v54, %v1541_v48  ;;  %v3352_v5 = vadd.f32 %v3295_v54, %v1542_v56 }
 0x627   :  { %v3355_v62 = vadd.f32 %v3295_v54, %v1543_v25  ;;  %v3358_v47 = vadd.f32 %v3295_v54, %v1544_v39  ;;  %v3361_v55 = vadd.f32 %v3295_v54, %v1545_v53  ;;  %v3364_v43 = vadd.f32 %v3295_v54, %v1546_v50  ;;  %v3765_v25 = vld [vmem:[#allocation40_spill] sm:$0xff]  ;;  %v3766_v53 = vld [vmem:[#allocation41_spill] sm:$0xff]  ;;  %v3767_v50 = vld [vmem:[#allocation42_spill] sm:$0xff] }
 0x628   :  { %v3367_v14 = vadd.f32 %v3295_v54, %v1547_v19  ;;  %v3370_v9 = vadd.f32 %v3295_v54, %v1548_v37  ;;  %v3373_v4 = vadd.f32 %v3295_v54, %v1549_v45  ;;  %v3376_v6 = vadd.f32 %v3295_v54, %v1550_v29  ;;  %v3768_v19 = vld [vmem:[#allocation43_spill] sm:$0xff] }
 0x629   :  { %v3379_v11 = vadd.f32 %v3295_v54, %v1551_v42  ;;  %v3382_v1 = vadd.f32 %v3295_v54, %v1552_v22  ;;  %v3385_v26 = vadd.f32 %v3295_v54, %v1553_v38  ;;  %v3388_v34 = vadd.f32 %v3295_v54, %v1554_v59  ;;  %v3770_v22 = vld [vmem:[#allocation37_spill] sm:$0xff] }
 0x62a   :  { %v3391_v12 = vadd.f32 %v3295_v54, %v1555_v15  ;;  %v3394_v49 = vadd.f32 %v3295_v54, %v1556_v57  ;;  %v3397_v2 = vadd.f32 %v3295_v54, %v1557_v44  ;;  %v3400_v27 = vadd.f32 %v3295_v54, %v1558_v58 }
 0x62b   :  { %v3403_v24 = vadd.f32 %v3295_v54, %v1559_v35  ;;  %v3406_v52 = vadd.f32 %v3295_v54, %v1560_v36  ;;  %v3409_v0 = vadd.f32 %v3295_v54, %v1562_v8  ;;  %v1596_v17 = vadd.f32 %v3295_v54, %v3243_v18  ;;  %v3771_v36 = vld [vmem:[#allocation38_spill] sm:$0xff] }
 0x62c   :  { %v1597_v41 = vadd.f32 %v3295_v54, %v3247_v16  ;;  %v1598_v32 = vadd.f32 %v3295_v54, %v3251_v63  ;;  %v1599_v40 = vadd.f32 %v3295_v54, %v3255_v31  ;;  %v1520_v48 = vmul.f32 %v3238_v10, %v2935_v33  ;;  %v2076_v33 = vld [vmem:[%s3699_s4 + $0x4] ss:$8 sps:$4 sm:$0xff]  }
 0x62d   :  { %v1522_v56 = vmul.f32 %v3238_v10, %v2939_v61  ;;  %v1524_v39 = vmul.f32 %v3238_v10, %v3765_v25  ;;  %v1525_v18 = vmul.f32 %v3238_v10, %v3766_v53  ;;  %v1526_v16 = vmul.f32 %v3238_v10, %v3767_v50  ;;  %v3769_v61 = vld [vmem:[#allocation35_spill] sm:$0xff]  ;;  %1784 = vmatprep.mubr.bf16.mxu0 %v2076_v33 }
 0x62e   :  { %v1527_v63 = vmul.f32 %v3238_v10, %v3768_v19  ;;  %v1660_v37 = vmax.f32 %v1596_v17, 0.0  ;;  %v1661_v31 = vmax.f32 %v1597_v41, 0.0  ;;  %v1662_v45 = vmax.f32 %v1598_v32, 0.0  ;;  %v3772_v17 = vld [vmem:[#allocation39_spill] sm:$0xff] }
 0x62f   :  { %v1663_v29 = vmax.f32 %v1599_v40, 0.0  ;;  %v1517_v42 = vmul.f32 %v3238_v10, %v3769_v61  ;;  %v1519_v38 = vmul.f32 %v3238_v10, %v3770_v22  ;;  %v1593_v59 = vadd.f32 %v3295_v54, %v1525_v18 }
 0x630   :  { %v1595_v15 = vadd.f32 %v3295_v54, %v1527_v63  ;;  %v3441_v57 = vadd.f32 %v3295_v54, %v1520_v48  ;;  %v3444_v44 = vadd.f32 %v3295_v54, %v1522_v56  ;;  %v1592_v58 = vadd.f32 %v3295_v54, %v1524_v39 }
 0x631   :  { %v1594_v35 = vadd.f32 %v3295_v54, %v1526_v16  ;;  %v1521_v8 = vmul.f32 %v3238_v10, %v3771_v36  ;;  %v1523_v41 = vmul.f32 %v3238_v10, %v3772_v17  ;;  %v3453_v32 = vadd.f32 %v3295_v54, %v1517_v42 }
 0x632   :  { %v3456_v40 = vadd.f32 %v3295_v54, %v1519_v38  ;;  %v1715_v48 = vpack.c.bf16 %v1663_v29, %v1661_v31  ;;  %v1714_v56 = vpack.c.bf16 %v1662_v45, %v1660_v37  ;;  %v1657_v53 = vmax.f32 %v1593_v59, 0.0  ;;  %v2079_v45 = vld [vmem:[%s3699_s4 + $0x14] ss:$8 sps:$4 sm:$0xff]  }
 0x633   :  { %v1589_v25 = vadd.f32 %v3295_v54, %v1521_v8  ;;  %v1591_v39 = vadd.f32 %v3295_v54, %v1523_v41  ;;  %v1659_v18 = vmax.f32 %v1595_v15, 0.0  ;;  %v1652_v50 = vmax.f32 %v3441_v57, 0.0  ;;  %1794 = vmatprep.mubr.bf16.mxu1 %v2079_v45  ;;  %v3778_v57 = vld [vmem:[#allocation32_spill] sm:$0xff] }
 0x634   :  { %v1654_v16 = vmax.f32 %v3444_v44, 0.0  ;;  %v1656_v19 = vmax.f32 %v1592_v58, 0.0  ;;  %v1658_v63 = vmax.f32 %v1594_v35, 0.0  ;;  %1752 = vmatprep.subr.bf16.mxu0 %v1715_v48  ;;  %1967 = vmatprep.subr.bf16.mxu1 %v1715_v48  ;;  %v1664_v33 = vmax.f32 %v3322_v28, 0.0 }
 0x635   :  { %v1666_v61 = vmax.f32 %v3328_v21, 0.0  ;;  %v1668_v37 = vmax.f32 %v3334_v51, 0.0  ;;  %1753 = vmatpush1.bf16.xpose.msra.mxu0 %v1714_v56  ;;  %1983 = vmatpush1.bf16.xpose.msra.mxu1 %v1714_v56  ;;  %v1713_v31 = vpack.c.bf16 %v1659_v18, %v1657_v53  ;;  %v1670_v29 = vmax.f32 %v3340_v13, 0.0 }
 0x636   :  { %v1672_v42 = vmax.f32 %v3346_v7, 0.0  ;;  %v1692_v22 = vmax.f32 %v3406_v52, 0.0  ;;  %v1694_v38 = vmax.f32 %v3409_v0, 0.0  ;;  %v1688_v28 = vmax.f32 %v3394_v49, 0.0 }
 0x637   :  { %v1690_v21 = vmax.f32 %v3400_v27, 0.0  ;;  %1754 = vmatprep.subr.bf16.mxu0 %v1713_v31  ;;  %1968 = vmatprep.subr.bf16.mxu1 %v1713_v31  ;;  %v1653_v51 = vmax.f32 %v1589_v25, 0.0  ;;  %v1655_v59 = vmax.f32 %v1591_v39, 0.0  ;;  %v1674_v15 = vmax.f32 %v3352_v5, 0.0 }
 0x638   :  { %v1676_v58 = vmax.f32 %v3358_v47, 0.0  ;;  %v1684_v13 = vmax.f32 %v3382_v1, 0.0  ;;  %v1686_v7 = vmax.f32 %v3388_v34, 0.0  ;;  %v1678_v52 = vmax.f32 %v3364_v43, 0.0 }
 0x639   :  { %v1680_v0 = vmax.f32 %v3370_v9, 0.0  ;;  %v1682_v49 = vmax.f32 %v3376_v6, 0.0  ;;  %v1712_v27 = vpack.c.bf16 %v1658_v63, %v1656_v19  ;;  %v1649_v35 = vmax.f32 %v3453_v32, 0.0  ;;  %v3773_v19 = vld [vmem:[#allocation34_spill] sm:$0xff] }
 0x63a   :  { %v1651_v36 = vmax.f32 %v3456_v40, 0.0  ;;  %v3483_v8 = vpack.c.bf16 %v1694_v38, %v1692_v22  ;;  %v1689_v5 = vmax.f32 %v3397_v2, 0.0  ;;  %v1711_v47 = vpack.c.bf16 %v1655_v59, %v1653_v51 }
 0x63b   :  { %v1691_v1 = vmax.f32 %v3403_v24, 0.0  ;;  %v3487_v34 = vpack.c.bf16 %v1690_v21, %v1688_v28  ;;  %v1685_v43 = vmax.f32 %v3385_v26, 0.0  ;;  %v1687_v9 = vmax.f32 %v3391_v12, 0.0 }
 0x63c   :  { %v3491_v17 = vpack.c.bf16 %v1686_v7, %v1684_v13  ;;  %v1681_v6 = vmax.f32 %v3373_v4, 0.0  ;;  %v1683_v41 = vmax.f32 %v3379_v11, 0.0  ;;  %v3497_v2 = vpack.c.bf16 %v1682_v49, %v1680_v0  ;;  %v3780_v7 = vld [vmem:[#allocation29_spill] sm:$0xff] }
 0x63d   :  { %1755 = vmatpush1.bf16.xpose.msra.mxu0 %v1712_v27  ;;  %1984 = vmatpush1.bf16.xpose.msra.mxu1 %v1712_v27  ;;  %v3495_v32 = vpack.c.bf16 %v1691_v1, %v1689_v5  ;;  %v1677_v24 = vmax.f32 %v3361_v55, 0.0  ;;  %v1679_v40 = vmax.f32 %v3367_v14, 0.0  ;;  %v3501_v26 = vpack.c.bf16 %v1687_v9, %v1685_v43 }
 0x63e   :  { %1756 = vmatprep.subr.bf16.mxu0 %v1711_v47  ;;  %1969 = vmatprep.subr.bf16.mxu1 %v1711_v47  ;;  %v3503_v12 = vpack.c.bf16 %v1683_v41, %v1681_v6  ;;  %v3505_v48 = vpack.c.bf16 %v1678_v52, %v1676_v58  ;;  %v1673_v4 = vmax.f32 %v3349_v3, 0.0  ;;  %v1675_v56 = vmax.f32 %v3355_v62, 0.0  ;;  %v3774_v3 = vld [vmem:[#allocation36_spill] sm:$0xff]  ;;  %v3777_v58 = vld [vmem:[#allocation30_spill] sm:$0xff] }
 0x63f   :  { %v3508_v11 = vpack.c.bf16 %v1679_v40, %v1677_v24  ;;  %v3511_v25 = vpack.c.bf16 %v1674_v15, %v1672_v42  ;;  %v1669_v55 = vmax.f32 %v3337_v46, 0.0  ;;  %v1671_v14 = vmax.f32 %v3343_v20, 0.0  ;;  %v3775_v42 = vld [vmem:[#allocation31_spill] sm:$0xff]  ;;  %v3776_v20 = vld [vmem:[#allocation33_spill] sm:$0xff]  ;;  %v3781_v6 = vld [vmem:[#allocation26_spill] sm:$0xff] }
 0x640   :  { %v3515_v39 = vpack.c.bf16 %v1670_v29, %v1668_v37  ;;  %v1665_v53 = vmax.f32 %v3325_v30, 0.0  ;;  %v1667_v18 = vmax.f32 %v3331_v23, 0.0  ;;  %v1516_v63 = vmul.f32 %v3238_v10, %v3773_v19  ;;  %v3782_v24 = vld [vmem:[#allocation28_spill] sm:$0xff] }
 0x641   :  { %v1518_v31 = vmul.f32 %v3238_v10, %v3774_v3  ;;  %v3523_v45 = vpack.c.bf16 %v1675_v56, %v1673_v4  ;;  %v3525_v62 = vpack.c.bf16 %v1666_v61, %v1664_v33  ;;  %v1513_v46 = vmul.f32 %v3238_v10, %v3775_v42  ;;  %v3783_v4 = vld [vmem:[#allocation23_spill] sm:$0xff] }
 0x642   :  { %v1515_v37 = vmul.f32 %v3238_v10, %v3776_v20  ;;  %v3531_v29 = vpack.c.bf16 %v1671_v14, %v1669_v55  ;;  %v3533_v30 = vpack.c.bf16 %v1667_v18, %v1665_v53  ;;  %v1584_v23 = vadd.f32 %v3295_v54, %v1516_v63  ;;  %v3784_v55 = vld [vmem:[#allocation25_spill] sm:$0xff] }
 0x643   :  { %v1586_v22 = vadd.f32 %v3295_v54, %v1518_v31  ;;  %v1710_v33 = vpack.c.bf16 %v1654_v16, %v1652_v50  ;;  %v1581_v61 = vadd.f32 %v3295_v54, %v1513_v46  ;;  %v1709_v28 = vpack.c.bf16 %v1651_v36, %v1649_v35  ;;  %v3779_v50 = vld [vmem:[#allocation27_spill] sm:$0xff] }
 0x644   :  { %v1583_v38 = vadd.f32 %v3295_v54, %v1515_v37  ;;  %v1648_v21 = vmax.f32 %v1584_v23, 0.0  ;;  %v1512_v13 = vmul.f32 %v3238_v10, %v3777_v58  ;;  %v1514_v44 = vmul.f32 %v3238_v10, %v3778_v57  ;;  %v3785_v23 = vld [vmem:[#allocation22_spill] sm:$0xff] }
 0x645   :  { %1757 = vmatpush1.bf16.xpose.msra.mxu0 %v1710_v33  ;;  %1985 = vmatpush1.bf16.xpose.msra.mxu1 %v1710_v33  ;;  %v1650_v51 = vmax.f32 %v1586_v22, 0.0  ;;  %v1645_v59 = vmax.f32 %v1581_v61, 0.0  ;;  %v1509_v16 = vmul.f32 %v3238_v10, %v3779_v50  ;;  %v1511_v52 = vmul.f32 %v3238_v10, %v3780_v7  ;;  %v3786_v33 = vld [vmem:[#allocation24_spill] sm:$0xff] }
 0x646   :  { %1758 = vmatprep.subr.bf16.mxu0 %v1709_v28  ;;  %1970 = vmatprep.subr.bf16.mxu1 %v1709_v28  ;;  %v1647_v15 = vmax.f32 %v1583_v38, 0.0  ;;  %v1580_v0 = vadd.f32 %v3295_v54, %v1512_v13  ;;  %v1582_v49 = vadd.f32 %v3295_v54, %v1514_v44  ;;  %v1508_v41 = vmul.f32 %v3238_v10, %v3781_v6  ;;  %v3787_v38 = vld [vmem:[#allocation19_spill] sm:$0xff] }
 0x647   :  { %v1708_v27 = vpack.c.bf16 %v1650_v51, %v1648_v21  ;;  %v1577_v35 = vadd.f32 %v3295_v54, %v1509_v16  ;;  %v1579_v36 = vadd.f32 %v3295_v54, %v1511_v52  ;;  %v1510_v40 = vmul.f32 %v3238_v10, %v3782_v24  ;;  %v3788_v21 = vld [vmem:[#allocation21_spill] sm:$0xff] }
 0x648   :  { %v1707_v5 = vpack.c.bf16 %v1647_v15, %v1645_v59  ;;  %v1644_v47 = vmax.f32 %v1580_v0, 0.0  ;;  %v1646_v1 = vmax.f32 %v1582_v49, 0.0  ;;  %v1505_v56 = vmul.f32 %v3238_v10, %v3783_v4  ;;  %v3789_v0 = vld [vmem:[#allocation18_spill] sm:$0xff] }
 0x649   :  { %v1641_v43 = vmax.f32 %v1577_v35, 0.0  ;;  %v1643_v9 = vmax.f32 %v1579_v36, 0.0  ;;  %v1507_v14 = vmul.f32 %v3238_v10, %v3784_v55  ;;  %v1576_v53 = vadd.f32 %v3295_v54, %v1508_v41  ;;  %v3791_v36 = vld [vmem:[#allocation44_spill] sm:$0xff] }
 0x64a   :  { %v1578_v18 = vadd.f32 %v3295_v54, %v1510_v40  ;;  %v1706_v19 = vpack.c.bf16 %v1646_v1, %v1644_v47  ;;  %v1573_v63 = vadd.f32 %v3295_v54, %v1505_v56  ;;  %v1504_v22 = vmul.f32 %v3238_v10, %v3785_v23  ;;  %v3792_v47 = vld [vmem:[#allocation45_spill] sm:$0xff] }
 0x64b   :  { %v1575_v3 = vadd.f32 %v3295_v54, %v1507_v14  ;;  %v1705_v31 = vpack.c.bf16 %v1643_v9, %v1641_v43  ;;  %v1640_v42 = vmax.f32 %v1576_v53, 0.0  ;;  %v1506_v61 = vmul.f32 %v3238_v10, %v3786_v33 }
 0x64c   :  { %v1642_v46 = vmax.f32 %v1578_v18, 0.0  ;;  %v1637_v20 = vmax.f32 %v1573_v63, 0.0  ;;  %v1501_v28 = vmul.f32 %v3238_v10, %v3787_v38  ;;  %v1503_v51 = vmul.f32 %v3238_v10, %v3788_v21 }
 0x64d   :  { %1759 = vmatpush1.bf16.xpose.msra.mxu0 %v1708_v27  ;;  %1986 = vmatpush1.bf16.xpose.msra.mxu1 %v1708_v27  ;;  %v1639_v37 = vmax.f32 %v1575_v3, 0.0  ;;  %v1572_v59 = vadd.f32 %v3295_v54, %v1504_v22  ;;  %v1574_v15 = vadd.f32 %v3295_v54, %v1506_v61  ;;  %v1500_v49 = vmul.f32 %v3238_v10, %v3789_v0  ;;  %v3790_v27 = vld [vmem:[#allocation20_spill] sm:$0xff] }
 0x64e   :  { %1760 = vmatprep.subr.bf16.mxu0 %v1707_v5  ;;  %1971 = vmatprep.subr.bf16.mxu1 %v1707_v5  ;;  %v1704_v58 = vpack.c.bf16 %v1642_v46, %v1640_v42  ;;  %v1569_v13 = vadd.f32 %v3295_v54, %v1501_v28  ;;  %v1571_v57 = vadd.f32 %v3295_v54, %v1503_v51 }
 0x64f   :  { %v1703_v44 = vpack.c.bf16 %v1639_v37, %v1637_v20  ;;  %v1636_v50 = vmax.f32 %v1572_v59, 0.0  ;;  %v1638_v16 = vmax.f32 %v1574_v15, 0.0  ;;  %v1502_v35 = vmul.f32 %v3238_v10, %v3790_v27 }
 0x650   :  { %v1633_v7 = vmax.f32 %v1569_v13, 0.0  ;;  %v1635_v52 = vmax.f32 %v1571_v57, 0.0  ;;  %v1561_v5 = vmul.f32 %v3238_v10, %v3791_v36  ;;  %v1563_v1 = vmul.f32 %v3238_v10, %v3792_v47 }
 0x651   :  { %v1568_v43 = vadd.f32 %v3295_v54, %v1500_v49  ;;  %v1570_v9 = vadd.f32 %v3295_v54, %v1502_v35  ;;  %v1702_v6 = vpack.c.bf16 %v1638_v16, %v1636_v50 }
 0x652   :  { %v1629_v41 = vadd.f32 %v3295_v54, %v1561_v5  ;;  %v1631_v24 = vadd.f32 %v3295_v54, %v1563_v1  ;;  %v1701_v40 = vpack.c.bf16 %v1635_v52, %v1633_v7  ;;  %v2074_v54 = vld [vmem:[%s3699_s4] ss:$8 sps:$4 sm:$0xff]  }
 0x653   :  { %v1632_v4 = vmax.f32 %v1568_v43, 0.0  ;;  %v1634_v56 = vmax.f32 %v1570_v9, 0.0  ;;  %v1850_v5 = vld [vmem:[#allocation2] sm:$0x1]  ;;  %v1857_v9 = vld [vmem:[#allocation3] sm:$0x1] }
 0x654   :  { %v1693_v55 = vmax.f32 %v1629_v41, 0.0  ;;  %v1695_v14 = vmax.f32 %v1631_v24, 0.0 }
 0x655   :  { %1761 = vmatpush1.bf16.xpose.msra.mxu0 %v1706_v19  ;;  %1987 = vmatpush1.bf16.xpose.msra.mxu1 %v1706_v19  ;;  %v1700_v53 = vpack.c.bf16 %v1634_v56, %v1632_v4 }
 0x656   :  { %1762 = vmatprep.subr.bf16.mxu0 %v1705_v31  ;;  %1972 = vmatprep.subr.bf16.mxu1 %v1705_v31  ;;  %v1731_v10 = vpack.c.bf16 %v1695_v14, %v1693_v55 }
 0x65d   :  { %1763 = vmatpush1.bf16.xpose.msra.mxu0 %v1704_v58  ;;  %1988 = vmatpush1.bf16.xpose.msra.mxu1 %v1704_v58 }
 0x65e   :  { %1764 = vmatprep.subr.bf16.mxu0 %v1703_v44  ;;  %1973 = vmatprep.subr.bf16.mxu1 %v1703_v44 }
 0x665   :  { %1765 = vmatpush1.bf16.xpose.msra.mxu0 %v1702_v6  ;;  %1989 = vmatpush1.bf16.xpose.msra.mxu1 %v1702_v6 }
 0x666   :  { %1766 = vmatprep.subr.bf16.mxu0 %v1701_v40  ;;  %1974 = vmatprep.subr.bf16.mxu1 %v1701_v40 }
 0x66d   :  { %1767 = vmatpush1.bf16.xpose.msra.mxu0 %v1700_v53  ;;  %1990 = vmatpush1.bf16.xpose.msra.mxu1 %v1700_v53 }
 0x66e   :  { %1768 = vmatprep.subr.bf16.mxu0 %v1731_v10  ;;  %1975 = vmatprep.subr.bf16.mxu1 %v1731_v10 }
 0x675   :  { %1769 = vmatpush2.bf16.xpose.msra.mxu0 %v3483_v8  ;;  %1991 = vmatpush2.bf16.xpose.msra.mxu1 %v3483_v8  ;;  %v2077_v8 = vld [vmem:[%s3699_s4 + $0x10] ss:$8 sps:$4 sm:$0xff]  }
 0x676   :  { %1770 = vmatprep.subr.bf16.mxu0 %v3495_v32  ;;  %1976 = vmatprep.subr.bf16.mxu1 %v3495_v32 }
 0x67d   :  { %1771 = vmatpush2.bf16.xpose.msra.mxu0 %v3487_v34  ;;  %1992 = vmatpush2.bf16.xpose.msra.mxu1 %v3487_v34 }
 0x67e   :  { %1772 = vmatprep.subr.bf16.mxu0 %v3501_v26  ;;  %1977 = vmatprep.subr.bf16.mxu1 %v3501_v26 }
 0x685   :  { %1773 = vmatpush2.bf16.xpose.msra.mxu0 %v3491_v17  ;;  %1993 = vmatpush2.bf16.xpose.msra.mxu1 %v3491_v17 }
 0x686   :  { %1774 = vmatprep.subr.bf16.mxu0 %v3503_v12  ;;  %1978 = vmatprep.subr.bf16.mxu1 %v3503_v12 }
 0x68d   :  { %1775 = vmatpush2.bf16.xpose.msra.mxu0 %v3497_v2  ;;  %1994 = vmatpush2.bf16.xpose.msra.mxu1 %v3497_v2 }
 0x68e   :  { %1776 = vmatprep.subr.bf16.mxu0 %v3508_v11  ;;  %1979 = vmatprep.subr.bf16.mxu1 %v3508_v11 }
 0x695   :  { %1777 = vmatpush2.bf16.xpose.msra.mxu0 %v3505_v48  ;;  %1995 = vmatpush2.bf16.xpose.msra.mxu1 %v3505_v48 }
 0x696   :  { %1778 = vmatprep.subr.bf16.mxu0 %v3523_v45  ;;  %1980 = vmatprep.subr.bf16.mxu1 %v3523_v45 }
 0x69d   :  { %1779 = vmatpush2.bf16.xpose.msra.mxu0 %v3511_v25  ;;  %1996 = vmatpush2.bf16.xpose.msra.mxu1 %v3511_v25 }
 0x69e   :  { %1780 = vmatprep.subr.bf16.mxu0 %v3531_v29  ;;  %1981 = vmatprep.subr.bf16.mxu1 %v3531_v29 }
 0x6a5   :  { %1781 = vmatpush2.bf16.xpose.msra.mxu0 %v3515_v39  ;;  %1997 = vmatpush2.bf16.xpose.msra.mxu1 %v3515_v39 }
 0x6a6   :  { %1782 = vmatprep.subr.bf16.mxu0 %v3533_v30  ;;  %1982 = vmatprep.subr.bf16.mxu1 %v3533_v30 }
 0x6ad   :  { %1783 = vmatpush2.bf16.xpose.msra.mxu0 %v3525_v62  ;;  %1998 = vmatpush2.bf16.xpose.msra.mxu1 %v3525_v62 }
 0x6b4   :  { %1785 = vmatmul.mubr.bf16.vlgmr.msra.gmra.mxu0 %v2074_v54  ;;  %1795 = vmatmul.mubr.bf16.vlgmr.msra.gmra.mxu1 %v2077_v8 }
 0x774   :  { %v3627_v34 = vpop.f32.mrf.mxu0  ;;  %v3629_v17 = vpop.f32.mrf.mxu1 }
 0x775   :  { %v1822_v2 = vmul.f32 %v3627_v34, %v3627_v34  ;;  %v1826_v29 = vmul.f32 %v3629_v17, %v3629_v17 }
 0x776   :  { %v3631_v32 = vpop.f32.mrf.mxu0  ;;  %v3641_v11 = vpop.f32.mrf.mxu1 }
 0x777   :  { %v1805_v26 = vadd.f32 %v3631_v32, %v3627_v34  ;;  %v1823_v12 = vmul.f32 %v3631_v32, %v3631_v32  ;;  %v1827_v42 = vmul.f32 %v3641_v11, %v3641_v11 }
 0x778   :  { %v3639_v48 = vpop.f32.mrf.mxu0  ;;  %v3653_v63 = vpop.f32.mrf.mxu1 }
 0x779   :  { %v1830_v25 = vadd.f32 %v1823_v12, %v1822_v2  ;;  %v1806_v39 = vadd.f32 %v1805_v26, %v3639_v48  ;;  %v1824_v45 = vmul.f32 %v3639_v48, %v3639_v48  ;;  %v1828_v23 = vmul.f32 %v3653_v63, %v3653_v63 }
 0x77a   :  { %v3646_v62 = vpop.f32.mrf.mxu0  ;;  %v1802_v37 = vpop.f32.mrf.mxu1 }
 0x77b   :  { %v1831_v30 = vadd.f32 %v1830_v25, %v1824_v45  ;;  %v1807_v18 = vadd.f32 %v1806_v39, %v3646_v62  ;;  %v1825_v19 = vmul.f32 %v3646_v62, %v3646_v62  ;;  %v1829_v61 = vmul.f32 %v1802_v37, %v1802_v37 }
 0x77d   :  { %v1808_v3 = vadd.f32 %v1807_v18, %v3629_v17  ;;  %v1832_v31 = vadd.f32 %v1831_v30, %v1825_v19 }
 0x77f   :  { %v1833_v46 = vadd.f32 %v1832_v31, %v1826_v29  ;;  %v1809_v20 = vadd.f32 %v1808_v3, %v3641_v11 }
 0x781   :  { %v1810_v22 = vadd.f32 %v1809_v20, %v3653_v63  ;;  %v1834_v33 = vadd.f32 %v1833_v46, %v1827_v42 }
 0x783   :  { %v1811_v38 = vadd.f32 %v1810_v22, %v1802_v37  ;;  %v1835_v28 = vadd.f32 %v1834_v33, %v1828_v23 }
 0x785   :  { %1812 = vadd.xlane.f32.xlu0 %v1811_v38  ;;  %v1836_v21 = vadd.f32 %v1835_v28, %v1829_v61 }
 0x787   :  { %1837 = vadd.xlane.f32.xlu1 %v1836_v21 }
 0x80e   :  { %v1813_v51 = vpop.xlane.xlu0 %1812 }
 0x80f   :  { %v1814_v59 = vrot.slane %v1813_v51, 4 }
 0x810   :  { %v1838_v15 = vpop.xlane.xlu1 %1837 }
 0x811   :  { %v1815_v58 = vadd.f32 %v1814_v59, %v1813_v51  ;;  %v1839_v13 = vrot.slane %v1838_v15, 4 }
 0x813   :  { %v1816_v57 = vrot.slane %v1815_v58, 2  ;;  %v1840_v44 = vadd.f32 %v1839_v13, %v1838_v15 }
 0x815   :  { %v1841_v50 = vrot.slane %v1840_v44, 2  ;;  %v1817_v16 = vadd.f32 %v1816_v57, %v1815_v58 }
 0x817   :  { %v1818_v7 = vrot.slane %v1817_v16, 1  ;;  %v1842_v52 = vadd.f32 %v1841_v50, %v1840_v44 }
 0x819   :  { %v1819_v0 = vadd.f32 %v1818_v7, %v1817_v16  ;;  %v1843_v49 = vrot.slane %v1842_v52, 1 }
 0x81b   :  { %1999 = vpush %v1819_v0  ;;  %v1844_v27 = vadd.f32 %v1843_v49, %v1842_v52 }
 0x81d   :  { %2001 = vpush %v1844_v27 }
 0x84c   :  { %s2000_s4 = spop %1999 }
 0x84d   :  { %s1821_s24 = smul.f32 0.00012207031, %s2000_s4 }
 0x84e   :  { %s2002_s25 = spop %2001 }
 0x84f   :  { %s1847_s26 = smul.f32 %s1821_s24, %s1821_s24  ;;  %v1858_v43 = vstv %s1821_s24 }
 0x850   :  { %s1846_s6 = smul.f32 0.00012207031, %s2002_s25 }
 0x852   :  { %s1848_s27 = ssub.f32 %s1846_s6, %s1847_s26 }
 0x854   :  { %s1849_s29 = smax.f32 %s2226_s28, %s1848_s27 }
 0x855   :  { %s1851_s8 = sadd.f32 1e-05, %s1849_s29 }
 0x857   :  { %v1852_v35 = vstv %s1851_s8 }
 0x858   :  { %2086 = vrsqrt.f32 %v1852_v35 }
 0x865   :  { %v2087_v36 = vpop.eup %2086 }
 0x866   :  { %2003 = vpush %v2087_v36 }
 0x897   :  { %s2004_s30 = spop %2003 }
 0x898   :  { %v1855_v47 = vstv %s2004_s30 }
 0x899   :  { %v1856_v1 = vmul.f32 %v1855_v47, %v1850_v5 }
 0x89b   :  { %v1859_v6 = vmul.f32 %v1858_v43, %v1856_v1  ;;  %v1865_v41 = vrot.slane %v1856_v1, %v2475_v60 }
 0x89d   :  { %v1860_v24 = vsub.f32 %v1857_v9, %v1859_v6  ;;  %1867 = vperm.xlu0 %2016, %v1865_v41  }
 0x89f   :  { %v1882_v40 = vrot.slane %v1860_v24, %v2475_v60 }
 0x8a1   :  { %1884 = vperm.xlu1 %2017, %v1882_v40  }
 0x918   :  { %v1868_v4 = vpop.permute.xlu0 %1867 }
 0x919   :  { %v1870_v56 = vmul.f32 %v1868_v4, %v3627_v34  ;;  %v1871_v55 = vmul.f32 %v1868_v4, %v3631_v32  ;;  %v1872_v14 = vmul.f32 %v1868_v4, %v3639_v48  ;;  %v1873_v53 = vmul.f32 %v1868_v4, %v3646_v62 }
 0x91a   :  { %v1874_v10 = vmul.f32 %v1868_v4, %v3629_v17  ;;  %v1875_v54 = vmul.f32 %v1868_v4, %v3641_v11  ;;  %v1876_v8 = vmul.f32 %v1868_v4, %v3653_v63  ;;  %v1877_v2 = vmul.f32 %v1868_v4, %v1802_v37 }
 0x91c   :  { %v1885_v26 = vpop.permute.xlu1 %1884 }
 0x91d   :  { %v1887_v12 = vadd.f32 %v1885_v26, %v1870_v56  ;;  %v1888_v60 = vadd.f32 %v1885_v26, %v1871_v55  ;;  %v1889_v25 = vadd.f32 %v1885_v26, %v1872_v14  ;;  %v1890_v39 = vadd.f32 %v1885_v26, %v1873_v53 }
 0x91e   :  { %v1891_v45 = vadd.f32 %v1885_v26, %v1874_v10  ;;  %v1892_v34 = vadd.f32 %v1885_v26, %v1875_v54  ;;  %v1893_v29 = vadd.f32 %v1885_v26, %v1876_v8  ;;  %v1894_v32 = vadd.f32 %v1885_v26, %v1877_v2 }
 0x91f   :  { %v1895_v30 = vmax.f32 %v1887_v12, 0.0  ;;  %v1896_v48 = vmax.f32 %v1888_v60, 0.0  ;;  %v1897_v18 = vmax.f32 %v1889_v25, 0.0  ;;  %v1898_v62 = vmax.f32 %v1890_v39, 0.0 }
 0x920   :  { %v1899_v19 = vmax.f32 %v1891_v45, 0.0  ;;  %v1900_v17 = vmax.f32 %v1892_v34, 0.0  ;;  %v1901_v3 = vmax.f32 %v1893_v29, 0.0  ;;  %v1902_v11 = vmax.f32 %v1894_v32, 0.0 }
 0x921   :  { %1903 = vst [vmem:[%s3707_s13] sm:$0xff] %v1895_v30  ;;  %1904 = vst [vmem:[%s3707_s13 + $0x8] sm:$0xff] %v1896_v48 }
 0x922   :  { %1905 = vst [vmem:[%s3707_s13 + $0x10] sm:$0xff] %v1897_v18  ;;  %1906 = vst [vmem:[%s3707_s13 + $0x18] sm:$0xff] %v1898_v62 }
 0x923   :  { %1907 = vst [vmem:[%s3707_s13 + $0x20] sm:$0xff] %v1899_v19  ;;  %1908 = vst [vmem:[%s3707_s13 + $0x28] sm:$0xff] %v1900_v17 }
 0x924   :  { %1909 = vst [vmem:[%s3707_s13 + $0x30] sm:$0xff] %v1901_v3  ;;  %1910 = vst [vmem:[%s3707_s13 + $0x38] sm:$0xff] %v1902_v11 }
 0x925   :  { %1915 = vsyncpa [#allocation5], 1 }
 0x926   :  { %1916 = vsyncpa [#allocation7], 1 }
 0x927   :  { %1917 = vsyncpa [#allocation10], 1 }
 0x928   :  { %1918 = vsyncpa [#allocation13], 1 }

</bundles_post_ra>
